<compile_context>
chip_gen: v7x
topology: tpu7x:2x2x1
jax: 0.10.0
libtpu: 0.0.40
codegen_flags: <defaults>
</compile_context>

<pallas_src>
import functools
import math

import jax
import jax.numpy as jnp
from jax.experimental import pallas as pl
from jax.experimental.pallas import tpu as pltpu


# ----------------------------------------------------------------------------
# Small helpers
# ----------------------------------------------------------------------------
def _round_up(x, m):
    return ((x + m - 1) // m) * m


@functools.lru_cache(maxsize=None)
def _vmem_budget_bytes():
    """Per-generation scoped-VMEM budget.

    v5e / v6e: 128 MiB per TensorCore -> use ~100 MiB.
    v7x:        64 MiB per TensorCore -> ~42 MiB (headroom for Mosaic scratch).
    Unknown:   conservative 42 MiB.
    """
    cap = 0
    try:
        info = pltpu.get_tpu_info()
        cap = int(getattr(info, "vmem_capacity_bytes", 0) or 0)
    except Exception:
        cap = 0
    if cap >= 128 * 1024 * 1024:
        return 100 * 1024 * 1024
    if cap > 0:
        return min((cap * 2) // 3, 42 * 1024 * 1024)
    return 42 * 1024 * 1024


def _pick_tiles(M, K_p, cout_p, budget):
    """Choose (tm, tn, tk, nk) so the double-buffered working set fits VMEM.

    Preference: no K-tiling and the largest possible tm; K-tiling (nk > 1) is
    only introduced when that is the only way to keep tm >= min(512, M).
    """
    usable = (budget * 3) // 4
    tn = min(cout_p, 512 if budget >= (80 << 20) else 256)
    M_a = _round_up(M, 16)
    tm_cands = sorted({min(c, M_a) for c in (1024, 512, 256, 128, 64, 32, 16)},
                      reverse=True)

    def vmem_need(tm, tk):
        return (2 * 2 * (tm * tk + tk * tn)   # bf16 patch + weight tiles, 2x buffered
                + 2 * 2 * tm * tn             # bf16 pre-BN output tile, 2x buffered
                + 4 * 4 * 8 * tn              # per-block stats outputs, 2x buffered
                + 4 * tm * tn)                # f32 accumulator scratch

    target_tm = min(512, M_a)
    best = None
    for nk_req in (1, 2, 3, 4, 6, 8, 12, 16):
        tk = _round_up(-(-K_p // nk_req), 128)
        nk = -(-K_p // tk)
        for tm in tm_cands:
            if vmem_need(tm, tk) <= usable:
                if best is None or tm > best[0]:
                    best = (tm, tk, nk)
                break
        if best is not None and best[0] >= target_tm:
            break
    if best is None:                                    # pathological fallback
        best = (tm_cands[-1], 128, -(-K_p // 128))
    tm, tk, nk = best
    return tm, tn, tk, nk


# ----------------------------------------------------------------------------
# Pallas kernels
# ----------------------------------------------------------------------------
def _gemm_stats_kernel(p_ref, w_ref, y_ref, sum_ref, ssq_ref, *scratch, nk):
    """bf16 GEMM (optionally K-tiled) -> bf16 pre-BN tile + per-block stats.

    Grid = (M blocks, Cout blocks, K blocks); K innermost ('arbitrary').
    sum/ssq are emitted per (M, Cout) block (not resident across M), so both
    M and Cout axes can be 'parallel' and shard across both TCs on v7x.
    The statistics are taken from the f32 accumulator BEFORE the bf16 cast.
    """
    prod = jnp.dot(p_ref[...], w_ref[...], preferred_element_type=jnp.float32)

    def finalize(acc):
        y_ref[...] = acc.astype(y_ref.dtype)
        s = jnp.sum(acc, axis=0, keepdims=True)           # (1, tn) f32
        q = jnp.sum(acc * acc, axis=0, keepdims=True)
        # Each of the 8 sublane rows carries the same block partial; the
        # wrapper's cross-block reduction divides by 8.
        sum_ref[...] = jnp.broadcast_to(s, sum_ref.shape)
        ssq_ref[...] = jnp.broadcast_to(q, ssq_ref.shape)

    if nk == 1:
        finalize(prod)
    else:
        acc_ref = scratch[0]
        k = pl.program_id(2)

        @pl.when(k == 0)
        def _():
            acc_ref[...] = prod

        @pl.when(jnp.logical_and(k > 0, k < nk - 1))
        def _():
            acc_ref[...] += prod

        @pl.when(k == nk - 1)
        def _():
            finalize(acc_ref[...] + prod)


def _bn_scale_shift(sum_ref, ssq_ref, g_ref, b_ref, inv_m):
    mean = sum_ref[...] * inv_m
    var = jnp.maximum(ssq_ref[...] * inv_m - mean * mean, 0.0)
    scale = g_ref[...] * jax.lax.rsqrt(var + 1e-5)        # gamma folded in
    shift = b_ref[...] - mean * scale
    return scale, shift


def _bn_lrelu_kernel(y_ref, sum_ref, ssq_ref, g_ref, b_ref, o_ref, *, inv_m):
    scale, shift = _bn_scale_shift(sum_ref, ssq_ref, g_ref, b_ref, inv_m)
    y = y_ref[...].astype(jnp.float32) * scale + shift
    o_ref[...] = jnp.maximum(y, 0.1 * y).astype(o_ref.dtype)


def _bn_lrelu_add_kernel(y_ref, sum_ref, ssq_ref, g_ref, b_ref, r_ref, o_ref,
                         *, inv_m):
    scale, shift = _bn_scale_shift(sum_ref, ssq_ref, g_ref, b_ref, inv_m)
    y = y_ref[...].astype(jnp.float32) * scale + shift
    y = jnp.maximum(y, 0.1 * y)                            # LeakyReLU(0.1)
    o_ref[...] = (y + r_ref[...].astype(jnp.float32)).astype(o_ref.dtype)


# ----------------------------------------------------------------------------
# Glue: im2col (slicing/reshape only, bf16) and the fused-layer wrapper
# ----------------------------------------------------------------------------
def _im2col(x, k, s):
    """x: (N, H, W, C) bf16 -> (N*Ho*Wo, k*k*C) patches, ordered [dy][dx][cin]."""
    N, H, W, C = x.shape
    if k == 1 and s == 1:
        return x.reshape(N * H * W, C), H, W
    pad = (k - 1) // 2
    if pad:
        x = jnp.pad(x, ((0, 0), (pad, pad), (pad, pad), (0, 0)))
    Ho = (H + 2 * pad - k) // s + 1
    Wo = (W + 2 * pad - k) // s + 1
    cols = []
    for dy in range(k):
        for dx in range(k):
            cols.append(
                x[:, dy:dy + s * (Ho - 1) + 1:s, dx:dx + s * (Wo - 1) + 1:s, :])
    p = cols[0] if len(cols) == 1 else jnp.concatenate(cols, axis=-1)
    return p.reshape(N * Ho * Wo, k * k * C), Ho, Wo


@functools.partial(jax.jit, static_argnames=("k", "stride", "cout", "K_p", "cout_p"))
def conv_bn_lrelu(x, w, gamma, beta, residual, *, k, stride, cout, K_p, cout_p):
    """Conv2d(bias=False) + BatchNorm2d(batch stats) + LeakyReLU(0.1) [+ residual].

    x: (N, H, W, cin) bf16.  Returns (N, Ho, Wo, cout) bf16.
    """
    N = x.shape[0]
    patches, Ho, Wo = _im2col(x.astype(jnp.bfloat16), k, stride)
    M, K = patches.shape

    budget = _vmem_budget_bytes()
    tm, tn, tk, nk = _pick_tiles(M, K_p, cout_p, budget)
    K_pad = tk * nk
    M_p = _round_up(M, tm)

    # Zero-pad rows (M tiles evenly; zero rows contribute 0 to the BN sums) and
    # the contraction dim (multiple of tk*nk, lane/MXU aligned), already bf16.
    patches = jnp.pad(patches, ((0, M_p - M), (0, K_pad - K)))
    if K_pad > K_p:
        w = jnp.pad(w, ((0, K_pad - K_p), (0, 0)))

    m_blocks = M_p // tm
    n_blocks = cout_p // tn

    # ---- pass 1: K-tiled bf16 GEMM + per-block channel sum / sum-of-squares --
    y_raw, psum, pssq = pl.pallas_call(
        functools.partial(_gemm_stats_kernel, nk=nk),
        out_shape=(
            jax.ShapeDtypeStruct((M_p, cout_p), jnp.bfloat16),
            jax.ShapeDtypeStruct((8 * m_blocks, cout_p), jnp.float32),
            jax.ShapeDtypeStruct((8 * m_blocks, cout_p), jnp.float32),
        ),
        grid=(m_blocks, n_blocks, nk),
        in_specs=[
            pl.BlockSpec((tm, tk), lambda m, j, kk: (m, kk)),   # patches tile
            pl.BlockSpec((tk, tn), lambda m, j, kk: (kk, j)),   # weight tile
        ],
        out_specs=(
            pl.BlockSpec((tm, tn), lambda m, j, kk: (m, j)),    # pre-BN (bf16)
            pl.BlockSpec((8, tn), lambda m, j, kk: (m, j)),     # partial sum
            pl.BlockSpec((8, tn), lambda m, j, kk: (m, j)),     # partial sumsq
        ),
        scratch_shapes=([pltpu.VMEM((tm, tn), jnp.float32)] if nk > 1 else []),
        compiler_params=pltpu.CompilerParams(
            dimension_semantics=("parallel", "parallel", "arbitrary"),
            vmem_limit_bytes=budget),
        cost_estimate=pl.CostEstimate(
            flops=2 * M_p * K_pad * cout_p,
            transcendentals=0,
            bytes_accessed=(M_p * K_pad * 2 * (n_blocks if nk > 1 else 1)
                            + K_pad * cout_p * 2 * (m_blocks if n_blocks > 1 else 1)
                            + M_p * cout_p * 2
                            + 2 * 8 * m_blocks * cout_p * 4)),
    )(patches, w)

    # Tiny cross-M-block reduction of the partial statistics (each block wrote
    # its partial replicated over 8 sublane rows -> divide by 8).
    csum = jnp.sum(psum, axis=0, keepdims=True) * 0.125
    cssq = jnp.sum(pssq, axis=0, keepdims=True) * 0.125

    # ---- pass 2: BatchNorm (batch stats) + LeakyReLU(0.1) (+ residual) ------
    inv_m = 1.0 / float(M)
    in_specs = [
        pl.BlockSpec((tm, tn), lambda m, j: (m, j)),   # y_raw (aliased to out)
        pl.BlockSpec((1, tn), lambda m, j: (0, j)),    # sum
        pl.BlockSpec((1, tn), lambda m, j: (0, j)),    # sumsq
        pl.BlockSpec((1, tn), lambda m, j: (0, j)),    # gamma
        pl.BlockSpec((1, tn), lambda m, j: (0, j)),    # beta
    ]
    args = [y_raw, csum, cssq, gamma, beta]
    if residual is not None:
        r = residual.astype(jnp.bfloat16).reshape(M, cout)
        r = jnp.pad(r, ((0, M_p - M), (0, cout_p - cout)))
        args.append(r)
        in_specs.append(pl.BlockSpec((tm, tn), lambda m, j: (m, j)))
        kernel = functools.partial(_bn_lrelu_add_kernel, inv_m=inv_m)
        n_big = 3
    else:
        kernel = functools.partial(_bn_lrelu_kernel, inv_m=inv_m)
        n_big = 2

    out = pl.pallas_call(
        kernel,
        out_shape=jax.ShapeDtypeStruct((M_p, cout_p), jnp.bfloat16),
        grid=(m_blocks, n_blocks),
        in_specs=in_specs,
        out_specs=pl.BlockSpec((tm, tn), lambda m, j: (m, j)),
        input_output_aliases={0: 0},          # write in place on the pre-BN buffer
        compiler_params=pltpu.CompilerParams(
            dimension_semantics=("parallel", "parallel"),
            vmem_limit_bytes=budget),
        cost_estimate=pl.CostEstimate(
            flops=8 * M_p * cout_p,
            transcendentals=cout_p,
            bytes_accessed=(n_big + 1) * M_p * cout_p * 2),
    )(*args)

    return out[:M, :cout].reshape(N, Ho, Wo, cout)


# ----------------------------------------------------------------------------
# Parameter construction (deterministic, synthetic)
# ----------------------------------------------------------------------------
def _init_cbl(key, cin, cout, k):
    # Weight stored as (K_p, cout_p) bf16, matching im2col [dy][dx][cin] order,
    # zero-padded on both dims to multiples of 128.
    K = k * k * cin
    K_p = _round_up(K, 128)
    cout_p = _round_up(cout, 128)
    w = jax.random.normal(key, (K, cout), jnp.float32) * (1.0 / math.sqrt(K))
    w = jnp.pad(w, ((0, K_p - K), (0, cout_p - cout))).astype(jnp.bfloat16)
    gamma = jnp.ones((1, cout_p), jnp.float32)    # BatchNorm default init
    beta = jnp.zeros((1, cout_p), jnp.float32)
    return dict(w=w, gamma=gamma, beta=beta, k=k, cin=cin, cout=cout,
                K_p=K_p, cout_p=cout_p)


def build_darknet53_params(key):
    layers = []
    counter = [0]

    def nk():
        counter[0] += 1
        return jax.random.fold_in(key, counter[0])

    def add_cbl(cin, cout, k, s):
        layers.append(("cbl", s, _init_cbl(nk(), cin, cout, k)))

    def add_block(in_out, hidden):
        layers.append(("block",
                       _init_cbl(nk(), in_out, hidden, 1),
                       _init_cbl(nk(), hidden, in_out, 3)))

    add_cbl(3, 32, 3, 1)
    add_cbl(32, 64, 3, 2)
    for _ in range(1):
        add_block(64, 32)
    add_cbl(64, 128, 3, 2)
    for _ in range(2):
        add_block(128, 64)
    add_cbl(128, 256, 3, 2)
    for _ in range(8):
        add_block(256, 128)
    assert len(layers) == 15
    add_cbl(256, 512, 3, 2)
    for _ in range(8):
        add_block(512, 256)
    assert len(layers) == 24
    add_cbl(512, 1024, 3, 2)
    for _ in range(4):
        add_block(1024, 512)
    assert len(layers) == 29
    return layers


# ----------------------------------------------------------------------------
# Darknet53 forward (NCHW in / NCHW out, like the PyTorch module)
# ----------------------------------------------------------------------------
def _run_cbl(x, p, stride, residual=None):
    return conv_bn_lrelu(x, p["w"], p["gamma"], p["beta"], residual,
                         k=p["k"], stride=stride, cout=p["cout"],
                         K_p=p["K_p"], cout_p=p["cout_p"])


def darknet53_forward(x_nchw, layers):
    x = jnp.transpose(x_nchw, (0, 2, 3, 1)).astype(jnp.bfloat16)   # -> NHWC bf16
    feats = {}
    for i, layer in enumerate(layers):
        if layer[0] == "cbl":
            _, s, p = layer
            x = _run_cbl(x, p, s)
        else:  # DarkBlock: 1x1 cbl -> 3x3 cbl -> + residual (after activation)
            _, p0, p1 = layer
            h = _run_cbl(x, p0, 1)
            x = _run_cbl(h, p1, 1, residual=x)
        if i == 14:
            feats["small"] = x
        elif i == 23:
            feats["medium"] = x
        elif i == 28:
            feats["large"] = x
    to_nchw = lambda t: jnp.transpose(t, (0, 3, 1, 2)).astype(jnp.float32)
    return to_nchw(feats["small"]), to_nchw(feats["medium"]), to_nchw(feats["large"])


if __name__ == "__main__":
    key = jax.random.PRNGKey(0)
    x = jax.random.normal(jax.random.fold_in(key, 1000), (2, 3, 16, 16), jnp.float32)
    params = build_darknet53_params(key)

    small, medium, large = darknet53_forward(x, params)
    jax.block_until_ready((small, medium, large))

    # Sanity: shape checks mirror the PyTorch module for a 16x16 input.
    assert small.shape == (2, 256, 2, 2), small.shape
    assert medium.shape == (2, 512, 1, 1), medium.shape
    assert large.shape == (2, 1024, 1, 1), large.shape
    assert all(bool(jnp.isfinite(t).all()) for t in (small, medium, large))

    print("KERNEL_OK")
</pallas_src>

<mosaic_0001>
module attributes {stable_mosaic.version = 11 : i64} {
  func.func @_gemm_stats_kernel(%arg0: i32, %arg1: i32, %arg2: i32, %arg3: memref<512x128xbf16, #tpu.memory_space<vmem>>, %arg4: memref<128x128xbf16, #tpu.memory_space<vmem>>, %arg5: memref<512x128xbf16, #tpu.memory_space<vmem>>, %arg6: memref<8x128xf32, #tpu.memory_space<vmem>>, %arg7: memref<8x128xf32, #tpu.memory_space<vmem>>) attributes {dimension_semantics = [#tpu.dimension_semantics<parallel>, #tpu.dimension_semantics<parallel>, #tpu.dimension_semantics<arbitrary>], iteration_bounds = array<i64: 1, 1, 1>, scalar_prefetch = 0 : i64, scratch_operands = 0 : i64, tpu.core_type = #tpu.core_type<tc>, window_params = [{transform_indices = @transform_0, window_bounds = array<i64: 512, 128>}, {transform_indices = @transform_1, window_bounds = array<i64: 128, 128>}, {transform_indices = @transform_2, window_bounds = array<i64: 512, 128>}, {transform_indices = @transform_3, window_bounds = array<i64: 8, 128>}, {transform_indices = @transform_4, window_bounds = array<i64: 8, 128>}]} {
    %c0 = arith.constant 0 : index
    %c0_0 = arith.constant 0 : index
    %0 = vector.load %arg3[%c0, %c0_0] : memref<512x128xbf16, #tpu.memory_space<vmem>>, vector<512x128xbf16>
    %c0_1 = arith.constant 0 : index
    %c0_2 = arith.constant 0 : index
    %1 = vector.load %arg4[%c0_1, %c0_2] : memref<128x128xbf16, #tpu.memory_space<vmem>>, vector<128x128xbf16>
    %cst = arith.constant dense<0.000000e+00> : vector<512x128xf32>
    %2 = tpu.matmul %0, %1, %cst {dimension_numbers = #tpu.dot_dimension_numbers<[1], [0], [0], [1], [0, 0, 1, 1], [], []>} : vector<512x128xbf16>, vector<128x128xbf16>, vector<512x128xf32> -> vector<512x128xf32>
    %3 = arith.truncf %2 : vector<512x128xf32> to vector<512x128xbf16>
    %c0_3 = arith.constant 0 : index
    %c0_4 = arith.constant 0 : index
    %4 = vector.load %arg5[%c0_3, %c0_4] : memref<512x128xbf16, #tpu.memory_space<vmem>>, vector<512x128xbf16>
    tpu.vector_store %arg5[%c0_3, %c0_4], %3 {strides = array<i32>} : memref<512x128xbf16, #tpu.memory_space<vmem>>, vector<512x128xbf16>,
    %cst_5 = arith.constant dense<0.000000e+00> : vector<128xf32>
    %5 = vector.multi_reduction <add>, %2, %cst_5 [0] : vector<512x128xf32> to vector<128xf32>
    %6 = vector.shape_cast %5 : vector<128xf32> to vector<1x128xf32>
    %7 = arith.mulf %2, %2 : vector<512x128xf32>
    %cst_6 = arith.constant dense<0.000000e+00> : vector<128xf32>
    %8 = vector.multi_reduction <add>, %7, %cst_6 [0] : vector<512x128xf32> to vector<128xf32>
    %9 = vector.shape_cast %8 : vector<128xf32> to vector<1x128xf32>
    %10 = vector.shape_cast %6 : vector<1x128xf32> to vector<1x128xf32>
    %11 = vector.broadcast %10 : vector<1x128xf32> to vector<8x128xf32>
    %c0_7 = arith.constant 0 : index
    %c0_8 = arith.constant 0 : index
    %12 = vector.load %arg6[%c0_7, %c0_8] : memref<8x128xf32, #tpu.memory_space<vmem>>, vector<8x128xf32>
    tpu.vector_store %arg6[%c0_7, %c0_8], %11 {strides = array<i32>} : memref<8x128xf32, #tpu.memory_space<vmem>>, vector<8x128xf32>,
    %13 = vector.shape_cast %9 : vector<1x128xf32> to vector<1x128xf32>
    %14 = vector.broadcast %13 : vector<1x128xf32> to vector<8x128xf32>
    %c0_9 = arith.constant 0 : index
    %c0_10 = arith.constant 0 : index
    %15 = vector.load %arg7[%c0_9, %c0_10] : memref<8x128xf32, #tpu.memory_space<vmem>>, vector<8x128xf32>
    tpu.vector_store %arg7[%c0_9, %c0_10], %14 {strides = array<i32>} : memref<8x128xf32, #tpu.memory_space<vmem>>, vector<8x128xf32>,
    return
  }
  func.func @transform_0(%arg0: i32, %arg1: i32, %arg2: i32) -> (i32, i32) {
    %c0_i32 = arith.constant 0 : i32
    return %arg0, %arg2 : i32, i32
  }
  func.func @transform_1(%arg0: i32, %arg1: i32, %arg2: i32) -> (i32, i32) {
    %c0_i32 = arith.constant 0 : i32
    return %arg2, %arg1 : i32, i32
  }
  func.func @transform_2(%arg0: i32, %arg1: i32, %arg2: i32) -> (i32, i32) {
    %c0_i32 = arith.constant 0 : i32
    return %arg0, %arg1 : i32, i32
  }
  func.func @transform_3(%arg0: i32, %arg1: i32, %arg2: i32) -> (i32, i32) {
    %c0_i32 = arith.constant 0 : i32
    return %arg0, %arg1 : i32, i32
  }
  func.func @transform_4(%arg0: i32, %arg1: i32, %arg2: i32) -> (i32, i32) {
    %c0_i32 = arith.constant 0 : i32
    return %arg0, %arg1 : i32, i32
  }
}

module attributes {stable_mosaic.version = 11 : i64} {
  func.func @_bn_lrelu_kernel(%arg0: i32, %arg1: i32, %arg2: memref<512x128xbf16, #tpu.memory_space<vmem>>, %arg3: memref<1x128xf32, #tpu.memory_space<vmem>>, %arg4: memref<1x128xf32, #tpu.memory_space<vmem>>, %arg5: memref<1x128xf32, #tpu.memory_space<vmem>>, %arg6: memref<1x128xf32, #tpu.memory_space<vmem>>, %arg7: memref<512x128xbf16, #tpu.memory_space<vmem>>) attributes {dimension_semantics = [#tpu.dimension_semantics<parallel>, #tpu.dimension_semantics<parallel>], iteration_bounds = array<i64: 1, 1>, scalar_prefetch = 0 : i64, scratch_operands = 0 : i64, tpu.core_type = #tpu.core_type<tc>, window_params = [{transform_indices = @transform_0, window_bounds = array<i64: 512, 128>}, {transform_indices = @transform_1, window_bounds = array<i64: 1, 128>}, {transform_indices = @transform_2, window_bounds = array<i64: 1, 128>}, {transform_indices = @transform_3, window_bounds = array<i64: 1, 128>}, {transform_indices = @transform_4, window_bounds = array<i64: 1, 128>}, {transform_indices = @transform_5, window_bounds = array<i64: 512, 128>}]} {
    %c0 = arith.constant 0 : index
    %c0_0 = arith.constant 0 : index
    %0 = vector.load %arg3[%c0, %c0_0] : memref<1x128xf32, #tpu.memory_space<vmem>>, vector<1x128xf32>
    %cst = arith.constant 0.001953125 : f32
    %1 = vector.broadcast %cst : f32 to vector<1x128xf32>
    %2 = arith.mulf %0, %1 : vector<1x128xf32>
    %c0_1 = arith.constant 0 : index
    %c0_2 = arith.constant 0 : index
    %3 = vector.load %arg4[%c0_1, %c0_2] : memref<1x128xf32, #tpu.memory_space<vmem>>, vector<1x128xf32>
    %cst_3 = arith.constant 0.001953125 : f32
    %4 = vector.broadcast %cst_3 : f32 to vector<1x128xf32>
    %5 = arith.mulf %3, %4 : vector<1x128xf32>
    %6 = arith.mulf %2, %2 : vector<1x128xf32>
    %7 = arith.subf %5, %6 : vector<1x128xf32>
    %cst_4 = arith.constant 0.000000e+00 : f32
    %8 = vector.broadcast %cst_4 : f32 to vector<1x128xf32>
    %9 = arith.maximumf %7, %8 : vector<1x128xf32>
    %c0_5 = arith.constant 0 : index
    %c0_6 = arith.constant 0 : index
    %10 = vector.load %arg5[%c0_5, %c0_6] : memref<1x128xf32, #tpu.memory_space<vmem>>, vector<1x128xf32>
    %cst_7 = arith.constant 9.99999974E-6 : f32
    %11 = vector.broadcast %cst_7 : f32 to vector<1x128xf32>
    %12 = arith.addf %9, %11 : vector<1x128xf32>
    %13 = math.rsqrt %12 : vector<1x128xf32>
    %14 = arith.mulf %10, %13 : vector<1x128xf32>
    %c0_8 = arith.constant 0 : index
    %c0_9 = arith.constant 0 : index
    %15 = vector.load %arg6[%c0_8, %c0_9] : memref<1x128xf32, #tpu.memory_space<vmem>>, vector<1x128xf32>
    %16 = arith.mulf %2, %14 : vector<1x128xf32>
    %17 = arith.subf %15, %16 : vector<1x128xf32>
    %c0_10 = arith.constant 0 : index
    %c0_11 = arith.constant 0 : index
    %18 = vector.load %arg2[%c0_10, %c0_11] : memref<512x128xbf16, #tpu.memory_space<vmem>>, vector<512x128xbf16>
    %19 = arith.extf %18 : vector<512x128xbf16> to vector<512x128xf32>
    %20 = vector.broadcast %14 : vector<1x128xf32> to vector<512x128xf32>
    %21 = arith.mulf %19, %20 : vector<512x128xf32>
    %22 = vector.broadcast %17 : vector<1x128xf32> to vector<512x128xf32>
    %23 = arith.addf %21, %22 : vector<512x128xf32>
    %cst_12 = arith.constant 1.000000e-01 : f32
    %24 = vector.broadcast %cst_12 : f32 to vector<512x128xf32>
    %25 = arith.mulf %24, %23 : vector<512x128xf32>
    %26 = arith.maximumf %23, %25 : vector<512x128xf32>
    %27 = arith.truncf %26 : vector<512x128xf32> to vector<512x128xbf16>
    %c0_13 = arith.constant 0 : index
    %c0_14 = arith.constant 0 : index
    %28 = vector.load %arg7[%c0_13, %c0_14] : memref<512x128xbf16, #tpu.memory_space<vmem>>, vector<512x128xbf16>
    tpu.vector_store %arg7[%c0_13, %c0_14], %27 {strides = array<i32>} : memref<512x128xbf16, #tpu.memory_space<vmem>>, vector<512x128xbf16>,
    return
  }
  func.func @transform_0(%arg0: i32, %arg1: i32) -> (i32, i32) {
    %c0_i32 = arith.constant 0 : i32
    return %arg0, %arg1 : i32, i32
  }
  func.func @transform_1(%arg0: i32, %arg1: i32) -> (i32, i32) {
    %c0_i32 = arith.constant 0 : i32
    %c0_i32_0 = arith.constant 0 : i32
    return %c0_i32, %arg1 : i32, i32
  }
  func.func @transform_2(%arg0: i32, %arg1: i32) -> (i32, i32) {
    %c0_i32 = arith.constant 0 : i32
    %c0_i32_0 = arith.constant 0 : i32
    return %c0_i32, %arg1 : i32, i32
  }
  func.func @transform_3(%arg0: i32, %arg1: i32) -> (i32, i32) {
    %c0_i32 = arith.constant 0 : i32
    %c0_i32_0 = arith.constant 0 : i32
    return %c0_i32, %arg1 : i32, i32
  }
  func.func @transform_4(%arg0: i32, %arg1: i32) -> (i32, i32) {
    %c0_i32 = arith.constant 0 : i32
    %c0_i32_0 = arith.constant 0 : i32
    return %c0_i32, %arg1 : i32, i32
  }
  func.func @transform_5(%arg0: i32, %arg1: i32) -> (i32, i32) {
    %c0_i32 = arith.constant 0 : i32
    return %arg0, %arg1 : i32, i32
  }
}

</mosaic_0001>

<bundles_post_ra>
// kernel: conv_bn_lrelu.3
= control target key start
LH: loop header
LB: loop body
LE: loop exit
PB: predicated region body
PF: predicated region fallthrough
CT: control target
= control target key end

     0   :  { %v163_v4 = vlaneseq  ;;  %s1868_s1 = inlined_call_operand.vmem [shape: f32[1,128], index: 1, kind: input, shape index: {}]   ;;  %s1869_s2 = inlined_call_operand.vmem [shape: f32[1,128], index: 2, kind: input, shape index: {}]   ;;  %s1870_s0 = inlined_call_operand.vmem [shape: bf16[512,128], index: 0, kind: input, shape index: {}, may-alias: {0,5}]   ;;  %s1871_s3 = inlined_call_operand.vmem [shape: f32[1,128], index: 3, kind: input, shape index: {}]   ;;  %s1872_s4 = inlined_call_operand.vmem [shape: f32[1,128], index: 4, kind: input, shape index: {}]   ;;  %s1873_s5 = inlined_call_operand.vmem [shape: bf16[512,128], index: 5, kind: output, shape index: {}, may-alias: {0,5}]  }
   0x1   :  { %v20_v0 = vld [vmem:[%s1868_s1] sm:$0x1]  ;;  %v1284_v9 = vld [vmem:[%s1870_s0 + $0x8] sm:$0xff]   ;;  %v1289_v11 = vld [vmem:[%s1870_s0 + $0x10] sm:$0xff]  }
   0x2   :  { %v22_v1 = vld [vmem:[%s1869_s2] sm:$0x1]  ;;  %v1270_v2 = vmul.f32 0.001953125, %v20_v0  ;;  %v1279_v8 = vshrl.u32 %v163_v4, 7  ;;  %v1294_v12 = vld [vmem:[%s1870_s0 + $0x18] sm:$0xff]   ;;  %v1306_v16 = vld [vmem:[%s1870_s0 + $0x28] sm:$0xff]   ;;  %v888_v19 = vunpack.c.l.bf16 %v1284_v9  ;;  %v889_v20 = vunpack.c.h.bf16 %v1284_v9 }
   0x3   :  { %v23_v3 = vmul.f32 0.001953125, %v22_v1  ;;  %v1277_v7 = vld [vmem:[%s1870_s0] sm:$0xff]   ;;  %v1314_v21 = vld [vmem:[%s1870_s0 + $0x30] sm:$0xff]   ;;  %v1319_v22 = vld [vmem:[%s1870_s0 + $0x38] sm:$0xff]   ;;  %v892_v23 = vunpack.c.l.bf16 %v1289_v11  ;;  %v893_v24 = vunpack.c.h.bf16 %v1289_v11  ;;  %v896_v25 = vunpack.c.l.bf16 %v1294_v12 }
   0x4   :  { %v24_v5 = vmul.f32 %v1270_v2, %v1270_v2  ;;  %v884_v13 = vunpack.c.l.bf16 %v1277_v7  ;;  %v885_v14 = vunpack.c.h.bf16 %v1277_v7  ;;  %v1301_v15 = vld [vmem:[%s1870_s0 + $0x20] sm:$0xff]   ;;  %v165_v18 = vsub.s32 0, %v1279_v8  ;;  %v1333_v28 = vld [vmem:[%s1870_s0 + $0x48] sm:$0xff]   ;;  %v1341_v32 = vld [vmem:[%s1870_s0 + $0x50] sm:$0xff]  }
   0x5   :  { %v897_v26 = vunpack.c.h.bf16 %v1294_v12  ;;  %v1328_v27 = vld [vmem:[%s1870_s0 + $0x40] sm:$0xff]   ;;  %v900_v29 = vunpack.c.l.bf16 %v1301_v15  ;;  %v901_v30 = vunpack.c.h.bf16 %v1301_v15  ;;  %v904_v31 = vunpack.c.l.bf16 %v1306_v16  ;;  %v1346_v33 = vld [vmem:[%s1870_s0 + $0x58] sm:$0xff]   ;;  %v1360_v39 = vld [vmem:[%s1870_s0 + $0x68] sm:$0xff]  }
   0x6   :  { %v25_v6 = vsub.f32 %v23_v3, %v24_v5  ;;  %v905_v34 = vunpack.c.h.bf16 %v1306_v16  ;;  %v908_v35 = vunpack.c.l.bf16 %v1314_v21  ;;  %v909_v36 = vunpack.c.h.bf16 %v1314_v21  ;;  %v1355_v38 = vld [vmem:[%s1870_s0 + $0x60] sm:$0xff]   ;;  %v1369_v44 = vld [vmem:[%s1870_s0 + $0x70] sm:$0xff]   ;;  %v1374_v45 = vld [vmem:[%s1870_s0 + $0x78] sm:$0xff]  }
   0x7   :  { %v1383_v50 = vld [vmem:[%s1870_s0 + $0x80] sm:$0xff]   ;;  %v1388_v51 = vld [vmem:[%s1870_s0 + $0x88] sm:$0xff]   ;;  %v1397_v56 = vld [vmem:[%s1870_s0 + $0x90] sm:$0xff]  }
   0x8   :  { %v26_v10 = vmax.f32 %v25_v6, 0.0  ;;  %v1402_v57 = vld [vmem:[%s1870_s0 + $0x98] sm:$0xff]   ;;  %v1411_v62 = vld [vmem:[%s1870_s0 + $0xa0] sm:$0xff]   ;;  %v1416_v63 = vld [vmem:[%s1870_s0 + $0xa8] sm:$0xff]  }
   0x9   :  { %v1425_v5 = vld [vmem:[%s1870_s0 + $0xb0] sm:$0xff]   ;;  %v1430_v6 = vld [vmem:[%s1870_s0 + $0xb8] sm:$0xff]   ;;  %v1439_v4 = vld [vmem:[%s1870_s0 + $0xc0] sm:$0xff]  }
   0xa   :  { %v28_v17 = vadd.f32 1e-05, %v26_v10  ;;  %v1444_v0 = vld [vmem:[%s1870_s0 + $0xc8] sm:$0xff]   ;;  %v27_v10 = vld [vmem:[%s1871_s3] sm:$0x1]  ;;  %v1456_v60 = vld [vmem:[%s1870_s0 + $0xd0] sm:$0xff]  }
   0xb   :  { %v1465_v1 = vld [vmem:[%s1870_s0 + $0xd8] sm:$0xff]   ;;  %v1470_v61 = vld [vmem:[%s1870_s0 + $0xe0] sm:$0xff]   ;;  %v1479_v54 = vld [vmem:[%s1870_s0 + $0xe8] sm:$0xff]  }
   0xc   :  { %1232 = vrsqrt.f32 %v28_v17  ;;  %v1487_v59 = vld [vmem:[%s1870_s0 + $0xf0] sm:$0xff]   ;;  %v1492_v55 = vld [vmem:[%s1870_s0 + $0xf8] sm:$0xff]  }
  0x16   :  { %v1233_v3 = vpop.eup %1232 }
  0x17   :  { %v30_v53 = vmul.f32 %v1233_v3, %v27_v10  ;;  %v31_v3 = vld [vmem:[%s1872_s4] sm:$0x1] }
  0x19   :  { %v32_v58 = vmul.f32 %v30_v53, %v1270_v2  ;;  %v1504_v17 = vrot.slane %v30_v53, %v165_v18 }
  0x1b   :  { %v33_v42 = vsub.f32 %v31_v3, %v32_v58  ;;  %v168_v2 = vmul.f32 %v884_v13, %v1504_v17  ;;  %v169_v53 = vmul.f32 %v885_v14, %v1504_v17  ;;  %v170_v46 = vmul.f32 %v888_v19, %v1504_v17 }
  0x1c   :  { %v171_v10 = vmul.f32 %v889_v20, %v1504_v17  ;;  %v172_v58 = vmul.f32 %v892_v23, %v1504_v17  ;;  %v173_v13 = vmul.f32 %v893_v24, %v1504_v17  ;;  %v174_v7 = vmul.f32 %v896_v25, %v1504_v17 }
  0x1d   :  { %v1535_v14 = vrot.slane %v33_v42, %v165_v18  ;;  %v175_v9 = vmul.f32 %v897_v26, %v1504_v17  ;;  %v176_v19 = vmul.f32 %v900_v29, %v1504_v17  ;;  %v177_v11 = vmul.f32 %v901_v30, %v1504_v17 }
  0x1e   :  { %v178_v20 = vmul.f32 %v904_v31, %v1504_v17  ;;  %v179_v8 = vmul.f32 %v905_v34, %v1504_v17  ;;  %v180_v12 = vmul.f32 %v908_v35, %v1504_v17  ;;  %v181_v18 = vmul.f32 %v909_v36, %v1504_v17 }
  0x1f   :  { %v238_v23 = vadd.f32 %v1535_v14, %v168_v2  ;;  %v239_v15 = vadd.f32 %v1535_v14, %v169_v53  ;;  %v240_v24 = vadd.f32 %v1535_v14, %v170_v46  ;;  %v241_v25 = vadd.f32 %v1535_v14, %v171_v10 }
  0x20   :  { %v242_v26 = vadd.f32 %v1535_v14, %v172_v58  ;;  %v243_v16 = vadd.f32 %v1535_v14, %v173_v13  ;;  %v244_v29 = vadd.f32 %v1535_v14, %v174_v7  ;;  %v245_v30 = vadd.f32 %v1535_v14, %v175_v9 }
  0x21   :  { %v302_v31 = vmul.f32 0.1, %v238_v23  ;;  %v303_v34 = vmul.f32 0.1, %v239_v15  ;;  %v304_v21 = vmul.f32 0.1, %v240_v24  ;;  %v246_v35 = vadd.f32 %v1535_v14, %v176_v19 }
  0x22   :  { %v305_v36 = vmul.f32 0.1, %v241_v25  ;;  %v306_v42 = vmul.f32 0.1, %v242_v26  ;;  %v307_v3 = vmul.f32 0.1, %v243_v16  ;;  %v247_v46 = vadd.f32 %v1535_v14, %v177_v11 }
  0x23   :  { %v366_v2 = vmax.f32 %v238_v23, %v302_v31  ;;  %v367_v10 = vmax.f32 %v239_v15, %v303_v34  ;;  %v368_v53 = vmax.f32 %v240_v24, %v304_v21  ;;  %v308_v58 = vmul.f32 0.1, %v244_v29 }
  0x24   :  { %v369_v48 = vmax.f32 %v241_v25, %v305_v36  ;;  %v370_v13 = vmax.f32 %v242_v26, %v306_v42  ;;  %v371_v49 = vmax.f32 %v243_v16, %v307_v3  ;;  %v309_v7 = vmul.f32 0.1, %v245_v30 }
  0x25   :  { %v1013_v43 = vpack.c.bf16 %v367_v10, %v366_v2  ;;  %v372_v9 = vmax.f32 %v244_v29, %v308_v58  ;;  %v310_v47 = vmul.f32 0.1, %v246_v35  ;;  %v311_v52 = vmul.f32 0.1, %v247_v46 }
  0x26   :  { %v1018_v41 = vpack.c.bf16 %v369_v48, %v368_v53  ;;  %v1023_v40 = vpack.c.bf16 %v371_v49, %v370_v13  ;;  %v373_v19 = vmax.f32 %v245_v30, %v309_v7  ;;  %v248_v37 = vadd.f32 %v1535_v14, %v178_v20 }
  0x27   :  { %1014 = vst [vmem:[%s1873_s5] sm:$0xff] %v1013_v43   ;;  %v374_v11 = vmax.f32 %v246_v35, %v310_v47  ;;  %v375_v23 = vmax.f32 %v247_v46, %v311_v52  ;;  %v249_v15 = vadd.f32 %v1535_v14, %v179_v8  ;;  %v250_v24 = vadd.f32 %v1535_v14, %v180_v12 }
  0x28   :  { %1201 = vst [vmem:[%s1873_s5 + $0x8] sm:$0xff] %v1018_v41   ;;  %1202 = vst [vmem:[%s1873_s5 + $0x10] sm:$0xff] %v1023_v40   ;;  %v1028_v48 = vpack.c.bf16 %v373_v19, %v372_v9  ;;  %v312_v49 = vmul.f32 0.1, %v248_v37  ;;  %v251_v20 = vadd.f32 %v1535_v14, %v181_v18  ;;  %v1874_v43 = vunpack.c.l.bf16 %v1319_v22 }
  0x29   :  { %v1033_v52 = vpack.c.bf16 %v375_v23, %v374_v11  ;;  %v313_v8 = vmul.f32 0.1, %v249_v15  ;;  %v314_v25 = vmul.f32 0.1, %v250_v24  ;;  %v1875_v12 = vunpack.c.h.bf16 %v1319_v22 }
  0x2a   :  { %v182_v47 = vmul.f32 %v1874_v43, %v1504_v17  ;;  %1203 = vst [vmem:[%s1873_s5 + $0x18] sm:$0xff] %v1028_v48   ;;  %v376_v40 = vmax.f32 %v248_v37, %v312_v49  ;;  %v315_v41 = vmul.f32 0.1, %v251_v20  ;;  %v1876_v18 = vunpack.c.l.bf16 %v1328_v27 }
  0x2b   :  { %v183_v26 = vmul.f32 %v1875_v12, %v1504_v17  ;;  %1204 = vst [vmem:[%s1873_s5 + $0x20] sm:$0xff] %v1033_v52   ;;  %v377_v30 = vmax.f32 %v249_v15, %v313_v8  ;;  %v378_v31 = vmax.f32 %v250_v24, %v314_v25  ;;  %v1877_v34 = vunpack.c.h.bf16 %v1328_v27 }
  0x2c   :  { %v252_v16 = vadd.f32 %v1535_v14, %v182_v47  ;;  %v184_v29 = vmul.f32 %v1876_v18, %v1504_v17  ;;  %v379_v37 = vmax.f32 %v251_v20, %v315_v41  ;;  %v1878_v42 = vunpack.c.l.bf16 %v1333_v28 }
  0x2d   :  { %v253_v22 = vadd.f32 %v1535_v14, %v183_v26  ;;  %v185_v21 = vmul.f32 %v1877_v34, %v1504_v17  ;;  %v1038_v46 = vpack.c.bf16 %v377_v30, %v376_v40  ;;  %v1879_v53 = vunpack.c.h.bf16 %v1333_v28 }
  0x2e   :  { %v316_v35 = vmul.f32 0.1, %v252_v16  ;;  %v254_v36 = vadd.f32 %v1535_v14, %v184_v29  ;;  %v186_v3 = vmul.f32 %v1878_v42, %v1504_v17  ;;  %v1043_v13 = vpack.c.bf16 %v379_v37, %v378_v31 }
  0x2f   :  { %v317_v2 = vmul.f32 0.1, %v253_v22  ;;  %v255_v10 = vadd.f32 %v1535_v14, %v185_v21  ;;  %v187_v58 = vmul.f32 %v1879_v53, %v1504_v17  ;;  %1205 = vst [vmem:[%s1873_s5 + $0x28] sm:$0xff] %v1038_v46   ;;  %v1880_v15 = vunpack.c.l.bf16 %v1341_v32 }
  0x30   :  { %v380_v7 = vmax.f32 %v252_v16, %v316_v35  ;;  %v318_v27 = vmul.f32 0.1, %v254_v36  ;;  %v256_v9 = vadd.f32 %v1535_v14, %v186_v3  ;;  %1206 = vst [vmem:[%s1873_s5 + $0x30] sm:$0xff] %v1043_v13   ;;  %v1881_v49 = vunpack.c.h.bf16 %v1341_v32 }
  0x31   :  { %v381_v19 = vmax.f32 %v253_v22, %v317_v2  ;;  %v319_v11 = vmul.f32 0.1, %v255_v10  ;;  %v257_v23 = vadd.f32 %v1535_v14, %v187_v58  ;;  %v188_v24 = vmul.f32 %v1880_v15, %v1504_v17 }
  0x32   :  { %v382_v28 = vmax.f32 %v254_v36, %v318_v27  ;;  %v320_v48 = vmul.f32 0.1, %v256_v9  ;;  %v189_v20 = vmul.f32 %v1881_v49, %v1504_v17  ;;  %v1882_v43 = vunpack.c.l.bf16 %v1346_v33 }
  0x33   :  { %v1048_v52 = vpack.c.bf16 %v381_v19, %v380_v7  ;;  %v383_v8 = vmax.f32 %v255_v10, %v319_v11  ;;  %v321_v25 = vmul.f32 0.1, %v257_v23  ;;  %v258_v12 = vadd.f32 %v1535_v14, %v188_v24 }
  0x34   :  { %v190_v47 = vmul.f32 %v1882_v43, %v1504_v17  ;;  %v384_v26 = vmax.f32 %v256_v9, %v320_v48  ;;  %v259_v40 = vadd.f32 %v1535_v14, %v189_v20  ;;  %v1883_v41 = vunpack.c.h.bf16 %v1346_v33 }
  0x35   :  { %1207 = vst [vmem:[%s1873_s5 + $0x38] sm:$0xff] %v1048_v52   ;;  %v1053_v32 = vpack.c.bf16 %v383_v8, %v382_v28  ;;  %v385_v29 = vmax.f32 %v257_v23, %v321_v25  ;;  %v322_v30 = vmul.f32 0.1, %v258_v12  ;;  %v1884_v31 = vunpack.c.l.bf16 %v1355_v38 }
  0x36   :  { %v191_v16 = vmul.f32 %v1883_v41, %v1504_v17  ;;  %v260_v18 = vadd.f32 %v1535_v14, %v190_v47  ;;  %v323_v34 = vmul.f32 0.1, %v259_v40  ;;  %v1885_v33 = vunpack.c.h.bf16 %v1355_v38 }
  0x37   :  { %v192_v22 = vmul.f32 %v1884_v31, %v1504_v17  ;;  %1208 = vst [vmem:[%s1873_s5 + $0x40] sm:$0xff] %v1053_v32   ;;  %v1058_v36 = vpack.c.bf16 %v385_v29, %v384_v26  ;;  %v386_v42 = vmax.f32 %v258_v12, %v322_v30  ;;  %v1886_v46 = vunpack.c.l.bf16 %v1360_v39 }
  0x38   :  { %v261_v21 = vadd.f32 %v1535_v14, %v191_v16  ;;  %v324_v37 = vmul.f32 0.1, %v260_v18  ;;  %v193_v35 = vmul.f32 %v1885_v33, %v1504_v17  ;;  %v387_v10 = vmax.f32 %v259_v40, %v323_v34 }
  0x39   :  { %v262_v3 = vadd.f32 %v1535_v14, %v192_v22  ;;  %v194_v2 = vmul.f32 %v1886_v46, %v1504_v17  ;;  %1209 = vst [vmem:[%s1873_s5 + $0x48] sm:$0xff] %v1058_v36   ;;  %v1887_v7 = vunpack.c.h.bf16 %v1360_v39  ;;  %v1888_v19 = vunpack.c.l.bf16 %v1369_v44 }
  0x3a   :  { %v325_v53 = vmul.f32 0.1, %v261_v21  ;;  %v388_v58 = vmax.f32 %v260_v18, %v324_v37  ;;  %v263_v13 = vadd.f32 %v1535_v14, %v193_v35  ;;  %v1063_v23 = vpack.c.bf16 %v387_v10, %v386_v42 }
  0x3b   :  { %v326_v38 = vmul.f32 0.1, %v262_v3  ;;  %v195_v27 = vmul.f32 %v1887_v7, %v1504_v17  ;;  %v264_v9 = vadd.f32 %v1535_v14, %v194_v2  ;;  %v196_v11 = vmul.f32 %v1888_v19, %v1504_v17 }
  0x3c   :  { %v389_v15 = vmax.f32 %v261_v21, %v325_v53  ;;  %v327_v24 = vmul.f32 0.1, %v263_v13  ;;  %v1889_v28 = vunpack.c.h.bf16 %v1369_v44  ;;  %1210 = vst [vmem:[%s1873_s5 + $0x50] sm:$0xff] %v1063_v23   ;;  %v1890_v25 = vunpack.c.l.bf16 %v1374_v45 }
  0x3d   :  { %v390_v49 = vmax.f32 %v262_v3, %v326_v38  ;;  %v265_v20 = vadd.f32 %v1535_v14, %v195_v27  ;;  %v328_v43 = vmul.f32 0.1, %v264_v9  ;;  %v266_v39 = vadd.f32 %v1535_v14, %v196_v11 }
  0x3e   :  { %v197_v48 = vmul.f32 %v1889_v28, %v1504_v17  ;;  %v1068_v47 = vpack.c.bf16 %v389_v15, %v388_v58  ;;  %v391_v52 = vmax.f32 %v263_v13, %v327_v24  ;;  %v198_v12 = vmul.f32 %v1890_v25, %v1504_v17 }
  0x3f   :  { %v329_v44 = vmul.f32 0.1, %v265_v20  ;;  %v392_v26 = vmax.f32 %v264_v9, %v328_v43  ;;  %v330_v40 = vmul.f32 0.1, %v266_v39  ;;  %v1891_v41 = vunpack.c.h.bf16 %v1374_v45 }
  0x40   :  { %v267_v8 = vadd.f32 %v1535_v14, %v197_v48  ;;  %1211 = vst [vmem:[%s1873_s5 + $0x58] sm:$0xff] %v1068_v47   ;;  %v1073_v18 = vpack.c.bf16 %v391_v52, %v390_v49  ;;  %v268_v29 = vadd.f32 %v1535_v14, %v198_v12  ;;  %v1892_v30 = vunpack.c.l.bf16 %v1383_v50 }
  0x41   :  { %v199_v16 = vmul.f32 %v1891_v41, %v1504_v17  ;;  %v393_v22 = vmax.f32 %v265_v20, %v329_v44  ;;  %v394_v34 = vmax.f32 %v266_v39, %v330_v40  ;;  %v1893_v45 = vunpack.c.h.bf16 %v1383_v50 }
  0x42   :  { %v331_v32 = vmul.f32 0.1, %v267_v8  ;;  %v200_v31 = vmul.f32 %v1892_v30, %v1504_v17  ;;  %1212 = vst [vmem:[%s1873_s5 + $0x60] sm:$0xff] %v1073_v18   ;;  %v332_v35 = vmul.f32 0.1, %v268_v29  ;;  %v1894_v42 = vunpack.c.l.bf16 %v1388_v51 }
  0x43   :  { %v269_v21 = vadd.f32 %v1535_v14, %v199_v16  ;;  %v201_v37 = vmul.f32 %v1893_v45, %v1504_v17  ;;  %v1078_v46 = vpack.c.bf16 %v393_v22, %v392_v26  ;;  %v1895_v50 = vunpack.c.h.bf16 %v1388_v51 }
  0x44   :  { %v395_v33 = vmax.f32 %v267_v8, %v331_v32  ;;  %v270_v36 = vadd.f32 %v1535_v14, %v200_v31  ;;  %v202_v3 = vmul.f32 %v1894_v42, %v1504_v17  ;;  %v396_v13 = vmax.f32 %v268_v29, %v332_v35 }
  0x45   :  { %v333_v2 = vmul.f32 0.1, %v269_v21  ;;  %v271_v10 = vadd.f32 %v1535_v14, %v201_v37  ;;  %v203_v53 = vmul.f32 %v1895_v50, %v1504_v17  ;;  %1213 = vst [vmem:[%s1873_s5 + $0x68] sm:$0xff] %v1078_v46   ;;  %v1896_v11 = vunpack.c.l.bf16 %v1397_v56 }
  0x46   :  { %v1083_v58 = vpack.c.bf16 %v395_v33, %v394_v34  ;;  %v334_v38 = vmul.f32 0.1, %v270_v36  ;;  %v272_v7 = vadd.f32 %v1535_v14, %v202_v3  ;;  %v1897_v24 = vunpack.c.h.bf16 %v1397_v56 }
  0x47   :  { %v397_v27 = vmax.f32 %v269_v21, %v333_v2  ;;  %v335_v9 = vmul.f32 0.1, %v271_v10  ;;  %v273_v19 = vadd.f32 %v1535_v14, %v203_v53  ;;  %v204_v23 = vmul.f32 %v1896_v11, %v1504_v17 }
  0x48   :  { %1214 = vst [vmem:[%s1873_s5 + $0x70] sm:$0xff] %v1083_v58   ;;  %v398_v51 = vmax.f32 %v270_v36, %v334_v38  ;;  %v336_v15 = vmul.f32 0.1, %v272_v7  ;;  %v205_v28 = vmul.f32 %v1897_v24, %v1504_v17  ;;  %v1898_v48 = vunpack.c.l.bf16 %v1402_v57 }
  0x49   :  { %v1088_v20 = vpack.c.bf16 %v397_v27, %v396_v13  ;;  %v399_v43 = vmax.f32 %v271_v10, %v335_v9  ;;  %v337_v39 = vmul.f32 0.1, %v273_v19  ;;  %v274_v47 = vadd.f32 %v1535_v14, %v204_v23 }
  0x4a   :  { %v206_v49 = vmul.f32 %v1898_v48, %v1504_v17  ;;  %v400_v52 = vmax.f32 %v272_v7, %v336_v15  ;;  %v275_v8 = vadd.f32 %v1535_v14, %v205_v28  ;;  %v1899_v25 = vunpack.c.h.bf16 %v1402_v57 }
  0x4b   :  { %1215 = vst [vmem:[%s1873_s5 + $0x78] sm:$0xff] %v1088_v20   ;;  %v1093_v56 = vpack.c.bf16 %v399_v43, %v398_v51  ;;  %v401_v26 = vmax.f32 %v273_v19, %v337_v39  ;;  %v338_v40 = vmul.f32 0.1, %v274_v47  ;;  %v1900_v41 = vunpack.c.l.bf16 %v1411_v62 }
  0x4c   :  { %v207_v12 = vmul.f32 %v1899_v25, %v1504_v17  ;;  %v276_v44 = vadd.f32 %v1535_v14, %v206_v49  ;;  %v339_v18 = vmul.f32 0.1, %v275_v8  ;;  %v1901_v57 = vunpack.c.h.bf16 %v1411_v62 }
  0x4d   :  { %v208_v16 = vmul.f32 %v1900_v41, %v1504_v17  ;;  %1216 = vst [vmem:[%s1873_s5 + $0x80] sm:$0xff] %v1093_v56   ;;  %v1098_v31 = vpack.c.bf16 %v401_v26, %v400_v52  ;;  %v402_v22 = vmax.f32 %v274_v47, %v338_v40  ;;  %v1902_v21 = vunpack.c.l.bf16 %v1416_v63 }
  0x4e   :  { %v277_v32 = vadd.f32 %v1535_v14, %v207_v12  ;;  %v340_v29 = vmul.f32 0.1, %v276_v44  ;;  %v209_v30 = vmul.f32 %v1901_v57, %v1504_v17  ;;  %v403_v37 = vmax.f32 %v275_v8, %v339_v18 }
  0x4f   :  { %v278_v34 = vadd.f32 %v1535_v14, %v208_v16  ;;  %v210_v45 = vmul.f32 %v1902_v21, %v1504_v17  ;;  %1217 = vst [vmem:[%s1873_s5 + $0x88] sm:$0xff] %v1098_v31   ;;  %v1903_v42 = vunpack.c.h.bf16 %v1416_v63  ;;  %v1904_v2 = vunpack.c.l.bf16 %v1425_v5 }
  0x50   :  { %v341_v33 = vmul.f32 0.1, %v277_v32  ;;  %v404_v35 = vmax.f32 %v276_v44, %v340_v29  ;;  %v279_v36 = vadd.f32 %v1535_v14, %v209_v30  ;;  %v1103_v50 = vpack.c.bf16 %v403_v37, %v402_v22 }
  0x51   :  { %v342_v62 = vmul.f32 0.1, %v278_v34  ;;  %v211_v3 = vmul.f32 %v1903_v42, %v1504_v17  ;;  %v280_v46 = vadd.f32 %v1535_v14, %v210_v45  ;;  %v212_v10 = vmul.f32 %v1904_v2, %v1504_v17 }
  0x52   :  { %v405_v53 = vmax.f32 %v277_v32, %v341_v33  ;;  %v343_v58 = vmul.f32 0.1, %v279_v36  ;;  %v1905_v13 = vunpack.c.h.bf16 %v1425_v5  ;;  %1218 = vst [vmem:[%s1873_s5 + $0x90] sm:$0xff] %v1103_v50   ;;  %v1906_v51 = vunpack.c.l.bf16 %v1430_v6 }
  0x53   :  { %v406_v7 = vmax.f32 %v278_v34, %v342_v62  ;;  %v281_v27 = vadd.f32 %v1535_v14, %v211_v3  ;;  %v344_v9 = vmul.f32 0.1, %v280_v46  ;;  %v282_v63 = vadd.f32 %v1535_v14, %v212_v10 }
  0x54   :  { %v213_v38 = vmul.f32 %v1905_v13, %v1504_v17  ;;  %v1108_v19 = vpack.c.bf16 %v405_v53, %v404_v35  ;;  %v407_v11 = vmax.f32 %v279_v36, %v343_v58  ;;  %v214_v15 = vmul.f32 %v1906_v51, %v1504_v17 }
  0x55   :  { %v345_v5 = vmul.f32 0.1, %v281_v27  ;;  %v408_v24 = vmax.f32 %v280_v46, %v344_v9  ;;  %v346_v28 = vmul.f32 0.1, %v282_v63  ;;  %v1907_v48 = vunpack.c.h.bf16 %v1430_v6 }
  0x56   :  { %v283_v23 = vadd.f32 %v1535_v14, %v213_v38  ;;  %1219 = vst [vmem:[%s1873_s5 + $0x98] sm:$0xff] %v1108_v19   ;;  %v1113_v20 = vpack.c.bf16 %v407_v11, %v406_v7  ;;  %v284_v39 = vadd.f32 %v1535_v14, %v214_v15  ;;  %v1908_v47 = vunpack.c.l.bf16 %v1439_v4 }
  0x57   :  { %v215_v49 = vmul.f32 %v1907_v48, %v1504_v17  ;;  %v409_v8 = vmax.f32 %v281_v27, %v345_v5  ;;  %v410_v25 = vmax.f32 %v282_v63, %v346_v28  ;;  %v1909_v6 = vunpack.c.h.bf16 %v1439_v4 }
  0x58   :  { %v347_v43 = vmul.f32 0.1, %v283_v23  ;;  %v216_v52 = vmul.f32 %v1908_v47, %v1504_v17  ;;  %1220 = vst [vmem:[%s1873_s5 + $0xa0] sm:$0xff] %v1113_v20   ;;  %v348_v26 = vmul.f32 0.1, %v284_v39  ;;  %v1910_v41 = vunpack.c.l.bf16 %v1444_v0 }
  0x59   :  { %v285_v12 = vadd.f32 %v1535_v14, %v215_v49  ;;  %v217_v44 = vmul.f32 %v1909_v6, %v1504_v17  ;;  %v1118_v18 = vpack.c.bf16 %v409_v8, %v408_v24  ;;  %v1911_v4 = vunpack.c.h.bf16 %v1444_v0 }
  0x5a   :  { %v411_v56 = vmax.f32 %v283_v23, %v347_v43  ;;  %v286_v40 = vadd.f32 %v1535_v14, %v216_v52  ;;  %v218_v16 = vmul.f32 %v1910_v41, %v1504_v17  ;;  %v412_v31 = vmax.f32 %v284_v39, %v348_v26 }
  0x5b   :  { %v349_v32 = vmul.f32 0.1, %v285_v12  ;;  %v287_v29 = vadd.f32 %v1535_v14, %v217_v44  ;;  %v219_v57 = vmul.f32 %v1911_v4, %v1504_v17  ;;  %1221 = vst [vmem:[%s1873_s5 + $0xa8] sm:$0xff] %v1118_v18   ;;  %v1912_v33 = vunpack.c.l.bf16 %v1456_v60 }
  0x5c   :  { %v1123_v30 = vpack.c.bf16 %v411_v56, %v410_v25  ;;  %v350_v22 = vmul.f32 0.1, %v286_v40  ;;  %v288_v34 = vadd.f32 %v1535_v14, %v218_v16  ;;  %v1913_v62 = vunpack.c.h.bf16 %v1456_v60 }
  0x5d   :  { %v413_v21 = vmax.f32 %v285_v12, %v349_v32  ;;  %v351_v45 = vmul.f32 0.1, %v287_v29  ;;  %v289_v37 = vadd.f32 %v1535_v14, %v219_v57  ;;  %v220_v35 = vmul.f32 %v1912_v33, %v1504_v17 }
  0x5e   :  { %1222 = vst [vmem:[%s1873_s5 + $0xb0] sm:$0xff] %v1123_v30   ;;  %v414_v0 = vmax.f32 %v286_v40, %v350_v22  ;;  %v352_v36 = vmul.f32 0.1, %v288_v34  ;;  %v221_v42 = vmul.f32 %v1913_v62, %v1504_v17  ;;  %v1914_v3 = vunpack.c.l.bf16 %v1465_v1 }
  0x5f   :  { %v1128_v2 = vpack.c.bf16 %v413_v21, %v412_v31  ;;  %v415_v10 = vmax.f32 %v287_v29, %v351_v45  ;;  %v353_v50 = vmul.f32 0.1, %v289_v37  ;;  %v290_v53 = vadd.f32 %v1535_v14, %v220_v35 }
  0x60   :  { %v222_v46 = vmul.f32 %v1914_v3, %v1504_v17  ;;  %v416_v58 = vmax.f32 %v288_v34, %v352_v36  ;;  %v291_v13 = vadd.f32 %v1535_v14, %v221_v42  ;;  %v1915_v38 = vunpack.c.h.bf16 %v1465_v1 }
  0x61   :  { %1223 = vst [vmem:[%s1873_s5 + $0xb8] sm:$0xff] %v1128_v2   ;;  %v1133_v60 = vpack.c.bf16 %v415_v10, %v414_v0  ;;  %v417_v9 = vmax.f32 %v289_v37, %v353_v50  ;;  %v354_v63 = vmul.f32 0.1, %v290_v53  ;;  %v1916_v19 = vunpack.c.l.bf16 %v1470_v61 }
  0x62   :  { %v223_v7 = vmul.f32 %v1915_v38, %v1504_v17  ;;  %v292_v27 = vadd.f32 %v1535_v14, %v222_v46  ;;  %v355_v23 = vmul.f32 0.1, %v291_v13  ;;  %v1917_v1 = vunpack.c.h.bf16 %v1470_v61 }
  0x63   :  { %v224_v11 = vmul.f32 %v1916_v19, %v1504_v17  ;;  %1224 = vst [vmem:[%s1873_s5 + $0xc0] sm:$0xff] %v1133_v60   ;;  %v1138_v24 = vpack.c.bf16 %v417_v9, %v416_v58  ;;  %v418_v28 = vmax.f32 %v290_v53, %v354_v63  ;;  %v1918_v49 = vunpack.c.l.bf16 %v1479_v54 }
  0x64   :  { %v293_v51 = vadd.f32 %v1535_v14, %v223_v7  ;;  %v356_v15 = vmul.f32 0.1, %v292_v27  ;;  %v225_v5 = vmul.f32 %v1917_v1, %v1504_v17  ;;  %v419_v43 = vmax.f32 %v291_v13, %v355_v23 }
  0x65   :  { %v294_v48 = vadd.f32 %v1535_v14, %v224_v11  ;;  %v226_v20 = vmul.f32 %v1918_v49, %v1504_v17  ;;  %1225 = vst [vmem:[%s1873_s5 + $0xc8] sm:$0xff] %v1138_v24   ;;  %v1919_v8 = vunpack.c.h.bf16 %v1479_v54  ;;  %v1920_v6 = vunpack.c.l.bf16 %v1487_v59 }
  0x66   :  { %v357_v39 = vmul.f32 0.1, %v293_v51  ;;  %v420_v47 = vmax.f32 %v292_v27, %v356_v15  ;;  %v295_v52 = vadd.f32 %v1535_v14, %v225_v5  ;;  %v1143_v56 = vpack.c.bf16 %v419_v43, %v418_v28 }
  0x67   :  { %v358_v61 = vmul.f32 0.1, %v294_v48  ;;  %v227_v25 = vmul.f32 %v1919_v8, %v1504_v17  ;;  %v296_v12 = vadd.f32 %v1535_v14, %v226_v20  ;;  %v228_v44 = vmul.f32 %v1920_v6, %v1504_v17 }
  0x68   :  { %v421_v26 = vmax.f32 %v293_v51, %v357_v39  ;;  %v359_v40 = vmul.f32 0.1, %v295_v52  ;;  %v1921_v41 = vunpack.c.h.bf16 %v1487_v59  ;;  %1226 = vst [vmem:[%s1873_s5 + $0xd0] sm:$0xff] %v1143_v56   ;;  %v1922_v31 = vunpack.c.l.bf16 %v1492_v55 }
  0x69   :  { %v422_v18 = vmax.f32 %v294_v48, %v358_v61  ;;  %v297_v32 = vadd.f32 %v1535_v14, %v227_v25  ;;  %v360_v29 = vmul.f32 0.1, %v296_v12  ;;  %v298_v54 = vadd.f32 %v1535_v14, %v228_v44 }
  0x6a   :  { %v229_v16 = vmul.f32 %v1921_v41, %v1504_v17  ;;  %v1148_v4 = vpack.c.bf16 %v421_v26, %v420_v47  ;;  %v423_v57 = vmax.f32 %v295_v52, %v359_v40  ;;  %v230_v22 = vmul.f32 %v1922_v31, %v1504_v17 }
  0x6b   :  { %v361_v59 = vmul.f32 0.1, %v297_v32  ;;  %v424_v34 = vmax.f32 %v296_v12, %v360_v29  ;;  %v362_v21 = vmul.f32 0.1, %v298_v54  ;;  %v1923_v45 = vunpack.c.h.bf16 %v1492_v55 }
  0x6c   :  { %v299_v30 = vadd.f32 %v1535_v14, %v229_v16  ;;  %1227 = vst [vmem:[%s1873_s5 + $0xd8] sm:$0xff] %v1148_v4   ;;  %v1153_v33 = vpack.c.bf16 %v423_v57, %v422_v18  ;;  %v300_v0 = vadd.f32 %v1535_v14, %v230_v22 }
  0x6d   :  { %v231_v37 = vmul.f32 %v1923_v45, %v1504_v17  ;;  %v425_v36 = vmax.f32 %v297_v32, %v361_v59  ;;  %v426_v62 = vmax.f32 %v298_v54, %v362_v21 }
  0x6e   :  { %v363_v35 = vmul.f32 0.1, %v299_v30  ;;  %1228 = vst [vmem:[%s1873_s5 + $0xe0] sm:$0xff] %v1153_v33   ;;  %v364_v46 = vmul.f32 0.1, %v300_v0 }
  0x6f   :  { %v301_v42 = vadd.f32 %v1535_v14, %v231_v37  ;;  %v1158_v55 = vpack.c.bf16 %v425_v36, %v424_v34 }
  0x70   :  { %v427_v3 = vmax.f32 %v299_v30, %v363_v35  ;;  %v428_v10 = vmax.f32 %v300_v0, %v364_v46 }
  0x71   :  { %v365_v17 = vmul.f32 0.1, %v301_v42  ;;  %1229 = vst [vmem:[%s1873_s5 + $0xe8] sm:$0xff] %v1158_v55  }
  0x72   :  { %v1163_v2 = vpack.c.bf16 %v427_v3, %v426_v62 }
  0x73   :  { %v429_v50 = vmax.f32 %v301_v42, %v365_v17 }
  0x74   :  { %1230 = vst [vmem:[%s1873_s5 + $0xf0] sm:$0xff] %v1163_v2  }
  0x75   :  { %v1168_v14 = vpack.c.bf16 %v429_v50, %v428_v10 }
  0x77   :  { %1231 = vst [vmem:[%s1873_s5 + $0xf8] sm:$0xff] %v1168_v14  }

// kernel: conv_bn_lrelu.2
= control target key start
LH: loop header
LB: loop body
LE: loop exit
PB: predicated region body
PF: predicated region fallthrough
CT: control target
= control target key end

     0   :  { %s2134_s1 = inlined_call_operand.vmem [shape: bf16[128,128], index: 1, kind: input, shape index: {}]   ;;  %s2135_s0 = inlined_call_operand.vmem [shape: bf16[512,128], index: 0, kind: input, shape index: {}]   ;;  %s2136_s2 = inlined_call_operand.vmem [shape: bf16[512,128], index: 2, kind: output, shape index: {0}]   ;;  %s2137_s3 = inlined_call_operand.vmem [shape: f32[8,128], index: 3, kind: output, shape index: {1}]   ;;  %s2138_s4 = inlined_call_operand.vmem [shape: f32[8,128], index: 4, kind: output, shape index: {2}]  }
   0x1   :  { %v1655_v0 = vld [vmem:[%s2134_s1] sm:$0xff]   ;;  %v1656_v1 = vld [vmem:[%s2134_s1 + $0x8] sm:$0xff]   ;;  %v1657_v2 = vld [vmem:[%s2134_s1 + $0x10] sm:$0xff]  }
   0x2   :  { %1559 = vmatprep.subr.bf16.mxu0 %v1655_v0  ;;  %1639 = vmatprep.subr.bf16.mxu1 %v1655_v0  ;;  %v1658_v3 = vld [vmem:[%s2134_s1 + $0x18] sm:$0xff]   ;;  %v1663_v4 = vld [vmem:[%s2135_s0] sm:$0xff]   ;;  %v1660_v6 = vld [vmem:[%s2134_s1 + $0x28] sm:$0xff]  }
   0x3   :  { %1560 = vmatpush3.bf16.msra.mxu0 %v1655_v0  ;;  %1647 = vmatpush3.bf16.msra.mxu1 %v1655_v0  ;;  %v1659_v5 = vld [vmem:[%s2134_s1 + $0x20] sm:$0xff]   ;;  %v1661_v7 = vld [vmem:[%s2134_s1 + $0x30] sm:$0xff]   ;;  %v1662_v8 = vld [vmem:[%s2134_s1 + $0x38] sm:$0xff]  }
   0x4   :  { %1561 = vmatprep.subr.bf16.mxu0 %v1656_v1  ;;  %1640 = vmatprep.subr.bf16.mxu1 %v1656_v1  ;;  %v1679_v9 = vld [vmem:[%s2135_s0 + $0x80] sm:$0xff]   ;;  %v1664_v10 = vld [vmem:[%s2135_s0 + $0x8] sm:$0xff]   ;;  %v1665_v11 = vld [vmem:[%s2135_s0 + $0x10] sm:$0xff]  }
   0x5   :  { %1575 = vmatprep.mubr.bf16.mxu0 %v1663_v4  ;;  %1607 = vmatprep.mubr.bf16.mxu1 %v1679_v9  ;;  %v1680_v12 = vld [vmem:[%s2135_s0 + $0x88] sm:$0xff]   ;;  %v1681_v13 = vld [vmem:[%s2135_s0 + $0x90] sm:$0xff]   ;;  %v1666_v14 = vld [vmem:[%s2135_s0 + $0x18] sm:$0xff]  }
   0x6   :  { %v1667_v15 = vld [vmem:[%s2135_s0 + $0x20] sm:$0xff]   ;;  %v1682_v16 = vld [vmem:[%s2135_s0 + $0x98] sm:$0xff]   ;;  %v1668_v18 = vld [vmem:[%s2135_s0 + $0x28] sm:$0xff]  }
   0x7   :  { %1562 = vmatpush3.bf16.msra.mxu0 %v1656_v1  ;;  %1648 = vmatpush3.bf16.msra.mxu1 %v1656_v1  ;;  %v1683_v17 = vld [vmem:[%s2135_s0 + $0xa0] sm:$0xff]   ;;  %v1684_v19 = vld [vmem:[%s2135_s0 + $0xa8] sm:$0xff]   ;;  %v1669_v20 = vld [vmem:[%s2135_s0 + $0x30] sm:$0xff]  }
   0x8   :  { %1563 = vmatprep.subr.bf16.mxu0 %v1657_v2  ;;  %1641 = vmatprep.subr.bf16.mxu1 %v1657_v2  ;;  %v1685_v21 = vld [vmem:[%s2135_s0 + $0xb0] sm:$0xff]   ;;  %v1670_v22 = vld [vmem:[%s2135_s0 + $0x38] sm:$0xff]   ;;  %v1671_v24 = vld [vmem:[%s2135_s0 + $0x40] sm:$0xff]  }
   0x9   :  { %v1686_v23 = vld [vmem:[%s2135_s0 + $0xb8] sm:$0xff]   ;;  %v1687_v25 = vld [vmem:[%s2135_s0 + $0xc0] sm:$0xff]   ;;  %v1672_v26 = vld [vmem:[%s2135_s0 + $0x48] sm:$0xff]  }
   0xa   :  { %v1688_v27 = vld [vmem:[%s2135_s0 + $0xc8] sm:$0xff]   ;;  %v1673_v28 = vld [vmem:[%s2135_s0 + $0x50] sm:$0xff]   ;;  %v1674_v30 = vld [vmem:[%s2135_s0 + $0x58] sm:$0xff]  }
   0xb   :  { %1564 = vmatpush3.bf16.msra.mxu0 %v1657_v2  ;;  %1649 = vmatpush3.bf16.msra.mxu1 %v1657_v2  ;;  %v1689_v29 = vld [vmem:[%s2135_s0 + $0xd0] sm:$0xff]   ;;  %v1690_v31 = vld [vmem:[%s2135_s0 + $0xd8] sm:$0xff]   ;;  %v1675_v32 = vld [vmem:[%s2135_s0 + $0x60] sm:$0xff]  }
   0xc   :  { %1565 = vmatprep.subr.bf16.mxu0 %v1658_v3  ;;  %1642 = vmatprep.subr.bf16.mxu1 %v1658_v3  ;;  %v1691_v33 = vld [vmem:[%s2135_s0 + $0xe0] sm:$0xff]   ;;  %v1676_v34 = vld [vmem:[%s2135_s0 + $0x68] sm:$0xff]   ;;  %v1677_v36 = vld [vmem:[%s2135_s0 + $0x70] sm:$0xff]  }
   0xd   :  { %v1692_v35 = vld [vmem:[%s2135_s0 + $0xe8] sm:$0xff]   ;;  %v1693_v37 = vld [vmem:[%s2135_s0 + $0xf0] sm:$0xff]   ;;  %v1678_v38 = vld [vmem:[%s2135_s0 + $0x78] sm:$0xff]  }
   0xe   :  { %v1694_v39 = vld [vmem:[%s2135_s0 + $0xf8] sm:$0xff]  }
   0xf   :  { %1566 = vmatpush3.bf16.msra.mxu0 %v1658_v3  ;;  %1650 = vmatpush3.bf16.msra.mxu1 %v1658_v3 }
  0x10   :  { %1567 = vmatprep.subr.bf16.mxu0 %v1659_v5  ;;  %1643 = vmatprep.subr.bf16.mxu1 %v1659_v5 }
  0x13   :  { %1568 = vmatpush3.bf16.msra.mxu0 %v1659_v5  ;;  %1651 = vmatpush3.bf16.msra.mxu1 %v1659_v5 }
  0x14   :  { %1569 = vmatprep.subr.bf16.mxu0 %v1660_v6  ;;  %1644 = vmatprep.subr.bf16.mxu1 %v1660_v6 }
  0x17   :  { %1570 = vmatpush3.bf16.msra.mxu0 %v1660_v6  ;;  %1652 = vmatpush3.bf16.msra.mxu1 %v1660_v6 }
  0x18   :  { %1571 = vmatprep.subr.bf16.mxu0 %v1661_v7  ;;  %1645 = vmatprep.subr.bf16.mxu1 %v1661_v7 }
  0x1b   :  { %1572 = vmatpush3.bf16.msra.mxu0 %v1661_v7  ;;  %1653 = vmatpush3.bf16.msra.mxu1 %v1661_v7 }
  0x1c   :  { %1573 = vmatprep.subr.bf16.mxu0 %v1662_v8  ;;  %1646 = vmatprep.subr.bf16.mxu1 %v1662_v8 }
  0x1f   :  { %1574 = vmatpush3.bf16.msra.mxu0 %v1662_v8  ;;  %1654 = vmatpush3.bf16.msra.mxu1 %v1662_v8 }
  0x22   :  { %1576 = vmatmul.mubr.bf16.vlgmr.msra.gmra.mrb[0].mxu0 %v1664_v10  ;;  %1608 = vmatmul.mubr.bf16.vlgmr.msra.gmra.mrb[0].mxu1 %v1680_v12 }
  0x23   :  { %1579 = vmatprep.mubr.bf16.mxu0 %v1665_v11  ;;  %1611 = vmatprep.mubr.bf16.mxu1 %v1681_v13 }
  0x2a   :  { %1580 = vmatmul.mubr.bf16.gmra.mrb[4].mxu0 %v1666_v14  ;;  %1612 = vmatmul.mubr.bf16.gmra.mrb[4].mxu1 %v1682_v16 }
  0x2b   :  { %1583 = vmatprep.mubr.bf16.mxu0 %v1667_v15  ;;  %1615 = vmatprep.mubr.bf16.mxu1 %v1683_v17 }
  0x32   :  { %1584 = vmatmul.mubr.bf16.gmra.mrb[8].mxu0 %v1668_v18  ;;  %1616 = vmatmul.mubr.bf16.gmra.mrb[8].mxu1 %v1684_v19 }
  0x33   :  { %1587 = vmatprep.mubr.bf16.mxu0 %v1669_v20  ;;  %1619 = vmatprep.mubr.bf16.mxu1 %v1685_v21 }
  0x3a   :  { %1588 = vmatmul.mubr.bf16.gmra.mrb[12].mxu0 %v1670_v22  ;;  %1620 = vmatmul.mubr.bf16.gmra.mrb[12].mxu1 %v1686_v23 }
  0x3b   :  { %1591 = vmatprep.mubr.bf16.mxu0 %v1671_v24  ;;  %1623 = vmatprep.mubr.bf16.mxu1 %v1687_v25 }
  0x42   :  { %1592 = vmatmul.mubr.bf16.gmra.mrb[16].mxu0 %v1672_v26  ;;  %1624 = vmatmul.mubr.bf16.gmra.mrb[16].mxu1 %v1688_v27 }
  0x43   :  { %1595 = vmatprep.mubr.bf16.mxu0 %v1673_v28  ;;  %1627 = vmatprep.mubr.bf16.mxu1 %v1689_v29 }
  0x4a   :  { %1596 = vmatmul.mubr.bf16.gmra.mrb[20].mxu0 %v1674_v30  ;;  %1628 = vmatmul.mubr.bf16.gmra.mrb[20].mxu1 %v1690_v31 }
  0x4b   :  { %1599 = vmatprep.mubr.bf16.mxu0 %v1675_v32  ;;  %1631 = vmatprep.mubr.bf16.mxu1 %v1691_v33 }
  0x52   :  { %1600 = vmatmul.mubr.bf16.gmra.mrb[24].mxu0 %v1676_v34  ;;  %1632 = vmatmul.mubr.bf16.gmra.mrb[24].mxu1 %v1692_v35 }
  0x53   :  { %1603 = vmatprep.mubr.bf16.mxu0 %v1677_v36  ;;  %1635 = vmatprep.mubr.bf16.mxu1 %v1693_v37 }
  0x5a   :  { %1604 = vmatmul.mubr.bf16.gmra.mrb[28].mxu0 %v1678_v38  ;;  %1636 = vmatmul.mubr.bf16.gmra.mrb[28].mxu1 %v1694_v39 }
  0xf5   :  { %v1577_v40 = vpop.f32.mrb[0].mxu0  ;;  %v1840_v41 = vpop.f32.mrb[0].mxu1 }
  0xf6   :  { %v369_v42 = vpop.f32.mrb[1].mxu0  ;;  %v1842_v43 = vpop.f32.mrb[1].mxu1  ;;  %v1015_v55 = vmul.f32 %v1577_v40, %v1577_v40 }
  0xf7   :  { %v1578_v44 = vpop.f32.mrb[2].mxu0  ;;  %v1844_v45 = vpop.f32.mrb[2].mxu1  ;;  %v1013_v46 = vmul.f32 %v369_v42, %v369_v42 }
  0xf8   :  { %v1336_v47 = vpack.c.bf16 %v1578_v44, %v1577_v40  ;;  %v372_v48 = vpop.f32.mrb[3].mxu0  ;;  %v1416_v49 = vpack.c.bf16 %v1844_v45, %v1840_v41  ;;  %v1848_v50 = vpop.f32.mrb[3].mxu1  ;;  %v1016_v58 = vmul.f32 %v1578_v44, %v1578_v44 }
  0xf9   :  { %v1331_v51 = vpack.c.bf16 %v372_v48, %v369_v42  ;;  %v944_v52 = vadd.f32 %v372_v48, %v369_v42  ;;  %v1014_v53 = vmul.f32 %v372_v48, %v372_v48  ;;  %v1411_v54 = vpack.c.bf16 %v1848_v50, %v1842_v43 }
  0xfa   :  { %1488 = vst [vmem:[%s2136_s2 + $0x8] sm:$0xff] %v1336_v47   ;;  %1504 = vst [vmem:[%s2136_s2 + $0x88] sm:$0xff] %v1416_v49  }
  0xfb   :  { %1332 = vst [vmem:[%s2136_s2] sm:$0xff] %v1331_v51   ;;  %v945_v56 = vadd.f32 %v1577_v40, %v944_v52  ;;  %v1077_v57 = vadd.f32 %v1014_v53, %v1013_v46  ;;  %1503 = vst [vmem:[%s2136_s2 + $0x80] sm:$0xff] %v1411_v54  }
  0xfd   :  { %v1078_v59 = vadd.f32 %v1077_v57, %v1015_v55  ;;  %v1581_v60 = vpop.f32.mrb[4].mxu0  ;;  %v946_v61 = vadd.f32 %v1578_v44, %v945_v56  ;;  %v1864_v62 = vpop.f32.mrb[4].mxu1 }
  0xfe   :  { %v385_v63 = vpop.f32.mrb[5].mxu0  ;;  %v1866_v0 = vpop.f32.mrb[5].mxu1  ;;  %v1019_v15 = vmul.f32 %v1581_v60, %v1581_v60 }
  0xff   :  { %v947_v1 = vadd.f32 %v946_v61, %v385_v63  ;;  %v1017_v2 = vmul.f32 %v385_v63, %v385_v63  ;;  %v1079_v3 = vadd.f32 %v1078_v59, %v1016_v58  ;;  %v1582_v4 = vpop.f32.mrb[6].mxu0  ;;  %v1868_v5 = vpop.f32.mrb[6].mxu1 }
 0x100   :  { %v1346_v6 = vpack.c.bf16 %v1582_v4, %v1581_v60  ;;  %v388_v7 = vpop.f32.mrb[7].mxu0  ;;  %v1426_v8 = vpack.c.bf16 %v1868_v5, %v1864_v62  ;;  %v1872_v9 = vpop.f32.mrb[7].mxu1  ;;  %v1020_v18 = vmul.f32 %v1582_v4, %v1582_v4 }
 0x101   :  { %v1080_v10 = vadd.f32 %v1079_v3, %v1017_v2  ;;  %v1341_v11 = vpack.c.bf16 %v388_v7, %v385_v63  ;;  %v948_v12 = vadd.f32 %v947_v1, %v388_v7  ;;  %v1018_v13 = vmul.f32 %v388_v7, %v388_v7 }
 0x102   :  { %1490 = vst [vmem:[%s2136_s2 + $0x18] sm:$0xff] %v1346_v6   ;;  %1506 = vst [vmem:[%s2136_s2 + $0x98] sm:$0xff] %v1426_v8   ;;  %v1421_v14 = vpack.c.bf16 %v1872_v9, %v1866_v0 }
 0x103   :  { %1489 = vst [vmem:[%s2136_s2 + $0x10] sm:$0xff] %v1341_v11   ;;  %v949_v16 = vadd.f32 %v1581_v60, %v948_v12  ;;  %v1081_v17 = vadd.f32 %v1080_v10, %v1018_v13 }
 0x104   :  { %1505 = vst [vmem:[%s2136_s2 + $0x90] sm:$0xff] %v1421_v14  }
 0x105   :  { %v1082_v19 = vadd.f32 %v1081_v17, %v1019_v15  ;;  %v1585_v20 = vpop.f32.mrb[8].mxu0  ;;  %v950_v21 = vadd.f32 %v1582_v4, %v949_v16  ;;  %v1888_v22 = vpop.f32.mrb[8].mxu1 }
 0x106   :  { %v401_v23 = vpop.f32.mrb[9].mxu0  ;;  %v1890_v24 = vpop.f32.mrb[9].mxu1  ;;  %v1023_v39 = vmul.f32 %v1585_v20, %v1585_v20 }
 0x107   :  { %v951_v25 = vadd.f32 %v950_v21, %v401_v23  ;;  %v1021_v26 = vmul.f32 %v401_v23, %v401_v23  ;;  %v1083_v27 = vadd.f32 %v1082_v19, %v1020_v18  ;;  %v1586_v28 = vpop.f32.mrb[10].mxu0  ;;  %v1892_v29 = vpop.f32.mrb[10].mxu1 }
 0x108   :  { %v1356_v30 = vpack.c.bf16 %v1586_v28, %v1585_v20  ;;  %v404_v31 = vpop.f32.mrb[11].mxu0  ;;  %v1436_v32 = vpack.c.bf16 %v1892_v29, %v1888_v22  ;;  %v1896_v33 = vpop.f32.mrb[11].mxu1  ;;  %v1024_v44 = vmul.f32 %v1586_v28, %v1586_v28 }
 0x109   :  { %v1084_v34 = vadd.f32 %v1083_v27, %v1021_v26  ;;  %v1351_v35 = vpack.c.bf16 %v404_v31, %v401_v23  ;;  %v952_v36 = vadd.f32 %v951_v25, %v404_v31  ;;  %v1022_v37 = vmul.f32 %v404_v31, %v404_v31 }
 0x10a   :  { %1492 = vst [vmem:[%s2136_s2 + $0x28] sm:$0xff] %v1356_v30   ;;  %1508 = vst [vmem:[%s2136_s2 + $0xa8] sm:$0xff] %v1436_v32   ;;  %v1431_v38 = vpack.c.bf16 %v1896_v33, %v1890_v24 }
 0x10b   :  { %1491 = vst [vmem:[%s2136_s2 + $0x20] sm:$0xff] %v1351_v35   ;;  %v953_v40 = vadd.f32 %v1585_v20, %v952_v36  ;;  %v1085_v42 = vadd.f32 %v1084_v34, %v1022_v37 }
 0x10c   :  { %1507 = vst [vmem:[%s2136_s2 + $0xa0] sm:$0xff] %v1431_v38  }
 0x10d   :  { %v1086_v46 = vadd.f32 %v1085_v42, %v1023_v39  ;;  %v1589_v47 = vpop.f32.mrb[12].mxu0  ;;  %v954_v48 = vadd.f32 %v1586_v28, %v953_v40  ;;  %v1912_v49 = vpop.f32.mrb[12].mxu1 }
 0x10e   :  { %v417_v51 = vpop.f32.mrb[13].mxu0  ;;  %v1914_v52 = vpop.f32.mrb[13].mxu1  ;;  %v1027_v6 = vmul.f32 %v1589_v47, %v1589_v47 }
 0x10f   :  { %v955_v53 = vadd.f32 %v954_v48, %v417_v51  ;;  %v1025_v54 = vmul.f32 %v417_v51, %v417_v51  ;;  %v1087_v55 = vadd.f32 %v1086_v46, %v1024_v44  ;;  %v1590_v56 = vpop.f32.mrb[14].mxu0  ;;  %v1916_v57 = vpop.f32.mrb[14].mxu1 }
 0x110   :  { %v1366_v58 = vpack.c.bf16 %v1590_v56, %v1589_v47  ;;  %v420_v59 = vpop.f32.mrb[15].mxu0  ;;  %v1446_v60 = vpack.c.bf16 %v1916_v57, %v1912_v49  ;;  %v1920_v61 = vpop.f32.mrb[15].mxu1  ;;  %v1028_v10 = vmul.f32 %v1590_v56, %v1590_v56 }
 0x111   :  { %v1088_v63 = vadd.f32 %v1087_v55, %v1025_v54  ;;  %v1361_v1 = vpack.c.bf16 %v420_v59, %v417_v51  ;;  %v956_v2 = vadd.f32 %v955_v53, %v420_v59  ;;  %v1026_v3 = vmul.f32 %v420_v59, %v420_v59 }
 0x112   :  { %1494 = vst [vmem:[%s2136_s2 + $0x38] sm:$0xff] %v1366_v58   ;;  %1510 = vst [vmem:[%s2136_s2 + $0xb8] sm:$0xff] %v1446_v60   ;;  %v1441_v4 = vpack.c.bf16 %v1920_v61, %v1914_v52 }
 0x113   :  { %1493 = vst [vmem:[%s2136_s2 + $0x30] sm:$0xff] %v1361_v1   ;;  %v957_v7 = vadd.f32 %v1589_v47, %v956_v2  ;;  %v1089_v8 = vadd.f32 %v1088_v63, %v1026_v3 }
 0x114   :  { %1509 = vst [vmem:[%s2136_s2 + $0xb0] sm:$0xff] %v1441_v4  }
 0x115   :  { %v1090_v11 = vadd.f32 %v1089_v8, %v1027_v6  ;;  %v1593_v12 = vpop.f32.mrb[16].mxu0  ;;  %v958_v13 = vadd.f32 %v1590_v56, %v957_v7  ;;  %v1936_v14 = vpop.f32.mrb[16].mxu1 }
 0x116   :  { %v433_v15 = vpop.f32.mrb[17].mxu0  ;;  %v1938_v16 = vpop.f32.mrb[17].mxu1  ;;  %v1031_v35 = vmul.f32 %v1593_v12, %v1593_v12 }
 0x117   :  { %v959_v17 = vadd.f32 %v958_v13, %v433_v15  ;;  %v1029_v18 = vmul.f32 %v433_v15, %v433_v15  ;;  %v1091_v19 = vadd.f32 %v1090_v11, %v1028_v10  ;;  %v1594_v20 = vpop.f32.mrb[18].mxu0  ;;  %v1940_v21 = vpop.f32.mrb[18].mxu1 }
 0x118   :  { %v1376_v23 = vpack.c.bf16 %v1594_v20, %v1593_v12  ;;  %v436_v25 = vpop.f32.mrb[19].mxu0  ;;  %v1456_v26 = vpack.c.bf16 %v1940_v21, %v1936_v14  ;;  %v1944_v27 = vpop.f32.mrb[19].mxu1  ;;  %v1032_v38 = vmul.f32 %v1594_v20, %v1594_v20 }
 0x119   :  { %v1092_v28 = vadd.f32 %v1091_v19, %v1029_v18  ;;  %v1371_v30 = vpack.c.bf16 %v436_v25, %v433_v15  ;;  %v960_v31 = vadd.f32 %v959_v17, %v436_v25  ;;  %v1030_v32 = vmul.f32 %v436_v25, %v436_v25 }
 0x11a   :  { %1496 = vst [vmem:[%s2136_s2 + $0x48] sm:$0xff] %v1376_v23   ;;  %1512 = vst [vmem:[%s2136_s2 + $0xc8] sm:$0xff] %v1456_v26   ;;  %v1451_v34 = vpack.c.bf16 %v1944_v27, %v1938_v16 }
 0x11b   :  { %1495 = vst [vmem:[%s2136_s2 + $0x40] sm:$0xff] %v1371_v30   ;;  %v961_v36 = vadd.f32 %v1593_v12, %v960_v31  ;;  %v1093_v37 = vadd.f32 %v1092_v28, %v1030_v32 }
 0x11c   :  { %1511 = vst [vmem:[%s2136_s2 + $0xc0] sm:$0xff] %v1451_v34  }
 0x11d   :  { %v1094_v39 = vadd.f32 %v1093_v37, %v1031_v35  ;;  %v1597_v40 = vpop.f32.mrb[20].mxu0  ;;  %v962_v42 = vadd.f32 %v1594_v20, %v961_v36  ;;  %v1960_v44 = vpop.f32.mrb[20].mxu1 }
 0x11e   :  { %v449_v46 = vpop.f32.mrb[21].mxu0  ;;  %v1962_v47 = vpop.f32.mrb[21].mxu1  ;;  %v1035_v6 = vmul.f32 %v1597_v40, %v1597_v40 }
 0x11f   :  { %v963_v48 = vadd.f32 %v962_v42, %v449_v46  ;;  %v1033_v51 = vmul.f32 %v449_v46, %v449_v46  ;;  %v1095_v53 = vadd.f32 %v1094_v39, %v1032_v38  ;;  %v1598_v54 = vpop.f32.mrb[22].mxu0  ;;  %v1964_v55 = vpop.f32.mrb[22].mxu1 }
 0x120   :  { %v1386_v56 = vpack.c.bf16 %v1598_v54, %v1597_v40  ;;  %v452_v58 = vpop.f32.mrb[23].mxu0  ;;  %v1466_v59 = vpack.c.bf16 %v1964_v55, %v1960_v44  ;;  %v1968_v60 = vpop.f32.mrb[23].mxu1  ;;  %v1036_v10 = vmul.f32 %v1598_v54, %v1598_v54 }
 0x121   :  { %v1096_v63 = vadd.f32 %v1095_v53, %v1033_v51  ;;  %v1381_v1 = vpack.c.bf16 %v452_v58, %v449_v46  ;;  %v964_v2 = vadd.f32 %v963_v48, %v452_v58  ;;  %v1034_v3 = vmul.f32 %v452_v58, %v452_v58 }
 0x122   :  { %1498 = vst [vmem:[%s2136_s2 + $0x58] sm:$0xff] %v1386_v56   ;;  %1514 = vst [vmem:[%s2136_s2 + $0xd8] sm:$0xff] %v1466_v59   ;;  %v1461_v4 = vpack.c.bf16 %v1968_v60, %v1962_v47 }
 0x123   :  { %1497 = vst [vmem:[%s2136_s2 + $0x50] sm:$0xff] %v1381_v1   ;;  %v965_v7 = vadd.f32 %v1597_v40, %v964_v2  ;;  %v1097_v8 = vadd.f32 %v1096_v63, %v1034_v3 }
 0x124   :  { %1513 = vst [vmem:[%s2136_s2 + $0xd0] sm:$0xff] %v1461_v4  }
 0x125   :  { %v1098_v11 = vadd.f32 %v1097_v8, %v1035_v6  ;;  %v1601_v12 = vpop.f32.mrb[24].mxu0  ;;  %v966_v13 = vadd.f32 %v1598_v54, %v965_v7  ;;  %v1984_v15 = vpop.f32.mrb[24].mxu1 }
 0x126   :  { %v465_v17 = vpop.f32.mrb[25].mxu0  ;;  %v1986_v18 = vpop.f32.mrb[25].mxu1  ;;  %v1039_v39 = vmul.f32 %v1601_v12, %v1601_v12 }
 0x127   :  { %v967_v19 = vadd.f32 %v966_v13, %v465_v17  ;;  %v1037_v20 = vmul.f32 %v465_v17, %v465_v17  ;;  %v1099_v23 = vadd.f32 %v1098_v11, %v1036_v10  ;;  %v1602_v25 = vpop.f32.mrb[26].mxu0  ;;  %v1988_v26 = vpop.f32.mrb[26].mxu1 }
 0x128   :  { %v1396_v28 = vpack.c.bf16 %v1602_v25, %v1601_v12  ;;  %v468_v30 = vpop.f32.mrb[27].mxu0  ;;  %v1476_v31 = vpack.c.bf16 %v1988_v26, %v1984_v15  ;;  %v1992_v32 = vpop.f32.mrb[27].mxu1  ;;  %v1040_v46 = vmul.f32 %v1602_v25, %v1602_v25 }
 0x129   :  { %v1100_v34 = vadd.f32 %v1099_v23, %v1037_v20  ;;  %v1391_v35 = vpack.c.bf16 %v468_v30, %v465_v17  ;;  %v968_v36 = vadd.f32 %v967_v19, %v468_v30  ;;  %v1038_v37 = vmul.f32 %v468_v30, %v468_v30 }
 0x12a   :  { %1500 = vst [vmem:[%s2136_s2 + $0x68] sm:$0xff] %v1396_v28   ;;  %1516 = vst [vmem:[%s2136_s2 + $0xe8] sm:$0xff] %v1476_v31   ;;  %v1471_v38 = vpack.c.bf16 %v1992_v32, %v1986_v18  ;;  %v1045_v31 = vmul.f32 %v1842_v43, %v1842_v43 }
 0x12b   :  { %1499 = vst [vmem:[%s2136_s2 + $0x60] sm:$0xff] %v1391_v35   ;;  %v969_v40 = vadd.f32 %v1601_v12, %v968_v36  ;;  %v1101_v42 = vadd.f32 %v1100_v34, %v1038_v37 }
 0x12c   :  { %1515 = vst [vmem:[%s2136_s2 + $0xe0] sm:$0xff] %v1471_v38   ;;  %v1046_v38 = vmul.f32 %v1848_v50, %v1848_v50 }
 0x12d   :  { %v1102_v48 = vadd.f32 %v1101_v42, %v1039_v39  ;;  %v1605_v51 = vpop.f32.mrb[28].mxu0  ;;  %v970_v53 = vadd.f32 %v1602_v25, %v969_v40  ;;  %v2008_v54 = vpop.f32.mrb[28].mxu1  ;;  %v1047_v39 = vmul.f32 %v1840_v41, %v1840_v41 }
 0x12e   :  { %v481_v56 = vpop.f32.mrb[29].mxu0  ;;  %v2010_v58 = vpop.f32.mrb[29].mxu1  ;;  %v1043_v19 = vmul.f32 %v1605_v51, %v1605_v51 }
 0x12f   :  { %v971_v59 = vadd.f32 %v970_v53, %v481_v56  ;;  %v1041_v63 = vmul.f32 %v481_v56, %v481_v56  ;;  %v1103_v1 = vadd.f32 %v1102_v48, %v1040_v46  ;;  %v1606_v2 = vpop.f32.mrb[30].mxu0  ;;  %v2012_v3 = vpop.f32.mrb[30].mxu1  ;;  %v1048_v46 = vmul.f32 %v1844_v45, %v1844_v45 }
 0x130   :  { %v1406_v4 = vpack.c.bf16 %v1606_v2, %v1605_v51  ;;  %v484_v6 = vpop.f32.mrb[31].mxu0  ;;  %v1486_v7 = vpack.c.bf16 %v2012_v3, %v2008_v54  ;;  %v2016_v8 = vpop.f32.mrb[31].mxu1  ;;  %v1044_v25 = vmul.f32 %v1606_v2, %v1606_v2 }
 0x131   :  { %v1104_v10 = vadd.f32 %v1103_v1, %v1041_v63  ;;  %v1401_v11 = vpack.c.bf16 %v484_v6, %v481_v56  ;;  %v972_v12 = vadd.f32 %v971_v59, %v484_v6  ;;  %v1042_v13 = vmul.f32 %v484_v6, %v484_v6 }
 0x132   :  { %1502 = vst [vmem:[%s2136_s2 + $0x78] sm:$0xff] %v1406_v4   ;;  %1518 = vst [vmem:[%s2136_s2 + $0xf8] sm:$0xff] %v1486_v7   ;;  %v1481_v17 = vpack.c.bf16 %v2016_v8, %v2010_v58  ;;  %v1050_v63 = vmul.f32 %v1872_v9, %v1872_v9 }
 0x133   :  { %1501 = vst [vmem:[%s2136_s2 + $0x70] sm:$0xff] %v1401_v11   ;;  %v973_v20 = vadd.f32 %v1605_v51, %v972_v12  ;;  %v1105_v23 = vadd.f32 %v1104_v10, %v1042_v13  ;;  %v1054_v12 = vmul.f32 %v1896_v33, %v1896_v33 }
 0x134   :  { %1517 = vst [vmem:[%s2136_s2 + $0xf0] sm:$0xff] %v1481_v17  }
 0x135   :  { %v1106_v28 = vadd.f32 %v1105_v23, %v1043_v19  ;;  %v974_v30 = vadd.f32 %v1606_v2, %v973_v20 }
 0x137   :  { %v975_v34 = vadd.f32 %v974_v30, %v1842_v43  ;;  %v1107_v35 = vadd.f32 %v1106_v28, %v1044_v25  ;;  %v1049_v43 = vmul.f32 %v1866_v0, %v1866_v0  ;;  %v1058_v30 = vmul.f32 %v1920_v61, %v1920_v61 }
 0x139   :  { %v1108_v36 = vadd.f32 %v1107_v35, %v1045_v31  ;;  %v976_v37 = vadd.f32 %v975_v34, %v1848_v50 }
 0x13b   :  { %v977_v40 = vadd.f32 %v1840_v41, %v976_v37  ;;  %v1109_v42 = vadd.f32 %v1108_v36, %v1046_v38  ;;  %v1051_v41 = vmul.f32 %v1864_v62, %v1864_v62 }
 0x13d   :  { %v1110_v48 = vadd.f32 %v1109_v42, %v1047_v39  ;;  %v978_v51 = vadd.f32 %v1844_v45, %v977_v40  ;;  %v1052_v45 = vmul.f32 %v1868_v5, %v1868_v5  ;;  %v1062_v40 = vmul.f32 %v1944_v27, %v1944_v27 }
 0x13f   :  { %v979_v53 = vadd.f32 %v978_v51, %v1866_v0  ;;  %v1111_v56 = vadd.f32 %v1110_v48, %v1048_v46  ;;  %v1053_v0 = vmul.f32 %v1890_v24, %v1890_v24 }
 0x141   :  { %v1112_v59 = vadd.f32 %v1111_v56, %v1049_v43  ;;  %v980_v50 = vadd.f32 %v979_v53, %v1872_v9 }
 0x143   :  { %v981_v1 = vadd.f32 %v1864_v62, %v980_v50  ;;  %v1113_v2 = vadd.f32 %v1112_v59, %v1050_v63  ;;  %v1055_v62 = vmul.f32 %v1888_v22, %v1888_v22  ;;  %v1066_v59 = vmul.f32 %v1968_v60, %v1968_v60 }
 0x145   :  { %v1114_v4 = vadd.f32 %v1113_v2, %v1051_v41  ;;  %v982_v6 = vadd.f32 %v1868_v5, %v981_v1  ;;  %v1056_v5 = vmul.f32 %v1892_v29, %v1892_v29 }
 0x147   :  { %v983_v7 = vadd.f32 %v982_v6, %v1890_v24  ;;  %v1115_v10 = vadd.f32 %v1114_v4, %v1052_v45  ;;  %v1057_v24 = vmul.f32 %v1914_v52, %v1914_v52  ;;  %v1070_v6 = vmul.f32 %v1992_v32, %v1992_v32 }
 0x149   :  { %v1116_v11 = vadd.f32 %v1115_v10, %v1053_v0  ;;  %v984_v9 = vadd.f32 %v983_v7, %v1896_v33 }
 0x14b   :  { %v985_v13 = vadd.f32 %v1888_v22, %v984_v9  ;;  %v1117_v17 = vadd.f32 %v1116_v11, %v1054_v12  ;;  %v1059_v22 = vmul.f32 %v1912_v49, %v1912_v49 }
 0x14d   :  { %v1118_v19 = vadd.f32 %v1117_v17, %v1055_v62  ;;  %v986_v20 = vadd.f32 %v1892_v29, %v985_v13  ;;  %v1060_v29 = vmul.f32 %v1916_v57, %v1916_v57  ;;  %v1074_v13 = vmul.f32 %v2016_v8, %v2016_v8 }
 0x14f   :  { %v987_v23 = vadd.f32 %v986_v20, %v1914_v52  ;;  %v1119_v25 = vadd.f32 %v1118_v19, %v1056_v5  ;;  %v1061_v52 = vmul.f32 %v1938_v16, %v1938_v16 }
 0x151   :  { %v1120_v28 = vadd.f32 %v1119_v25, %v1057_v24  ;;  %v988_v33 = vadd.f32 %v987_v23, %v1920_v61 }
 0x153   :  { %v989_v31 = vadd.f32 %v1912_v49, %v988_v33  ;;  %v1121_v34 = vadd.f32 %v1120_v28, %v1058_v30  ;;  %v1063_v49 = vmul.f32 %v1936_v14, %v1936_v14 }
 0x155   :  { %v1122_v35 = vadd.f32 %v1121_v34, %v1059_v22  ;;  %v990_v36 = vadd.f32 %v1916_v57, %v989_v31  ;;  %v1064_v57 = vmul.f32 %v1940_v21, %v1940_v21 }
 0x157   :  { %v991_v37 = vadd.f32 %v990_v36, %v1938_v16  ;;  %v1123_v38 = vadd.f32 %v1122_v35, %v1060_v29  ;;  %v1065_v16 = vmul.f32 %v1962_v47, %v1962_v47 }
 0x159   :  { %v1124_v39 = vadd.f32 %v1123_v38, %v1061_v52  ;;  %v992_v61 = vadd.f32 %v991_v37, %v1944_v27 }
 0x15b   :  { %v993_v42 = vadd.f32 %v1936_v14, %v992_v61  ;;  %v1125_v46 = vadd.f32 %v1124_v39, %v1062_v40  ;;  %v1067_v14 = vmul.f32 %v1960_v44, %v1960_v44 }
 0x15d   :  { %v1126_v48 = vadd.f32 %v1125_v46, %v1063_v49  ;;  %v994_v51 = vadd.f32 %v1940_v21, %v993_v42  ;;  %v1068_v21 = vmul.f32 %v1964_v55, %v1964_v55 }
 0x15f   :  { %v995_v43 = vadd.f32 %v994_v51, %v1962_v47  ;;  %v1127_v53 = vadd.f32 %v1126_v48, %v1064_v57  ;;  %v1069_v47 = vmul.f32 %v1986_v18, %v1986_v18 }
 0x161   :  { %v1128_v56 = vadd.f32 %v1127_v53, %v1065_v16  ;;  %v996_v27 = vadd.f32 %v995_v43, %v1968_v60 }
 0x163   :  { %v997_v50 = vadd.f32 %v1960_v44, %v996_v27  ;;  %v1129_v63 = vadd.f32 %v1128_v56, %v1066_v59  ;;  %v1071_v44 = vmul.f32 %v1984_v15, %v1984_v15 }
 0x165   :  { %v1130_v41 = vadd.f32 %v1129_v63, %v1067_v14  ;;  %v998_v1 = vadd.f32 %v1964_v55, %v997_v50  ;;  %v1072_v55 = vmul.f32 %v1988_v26, %v1988_v26 }
 0x167   :  { %v999_v2 = vadd.f32 %v998_v1, %v1986_v18  ;;  %v1131_v45 = vadd.f32 %v1130_v41, %v1068_v21  ;;  %v1073_v18 = vmul.f32 %v2010_v58, %v2010_v58 }
 0x169   :  { %v1132_v4 = vadd.f32 %v1131_v45, %v1069_v47  ;;  %v1000_v60 = vadd.f32 %v999_v2, %v1992_v32 }
 0x16b   :  { %v1001_v0 = vadd.f32 %v1984_v15, %v1000_v60  ;;  %v1133_v7 = vadd.f32 %v1132_v4, %v1070_v6  ;;  %v1075_v15 = vmul.f32 %v2008_v54, %v2008_v54 }
 0x16d   :  { %v1134_v10 = vadd.f32 %v1133_v7, %v1071_v44  ;;  %v1002_v11 = vadd.f32 %v1988_v26, %v1001_v0  ;;  %v1076_v26 = vmul.f32 %v2012_v3, %v2012_v3 }
 0x16f   :  { %v1003_v9 = vadd.f32 %v1002_v11, %v2010_v58  ;;  %v1135_v12 = vadd.f32 %v1134_v10, %v1072_v55 }
 0x171   :  { %v1136_v62 = vadd.f32 %v1135_v12, %v1073_v18  ;;  %v1004_v32 = vadd.f32 %v1003_v9, %v2016_v8 }
 0x173   :  { %v1005_v17 = vadd.f32 %v2008_v54, %v1004_v32  ;;  %v1137_v5 = vadd.f32 %v1136_v62, %v1074_v13 }
 0x175   :  { %v1006_v19 = vadd.f32 %v2012_v3, %v1005_v17  ;;  %v1138_v20 = vadd.f32 %v1137_v5, %v1075_v15 }
 0x177   :  { %v1007_v58 = vrot.slane %v1006_v19, 4  ;;  %v1139_v24 = vadd.f32 %v1138_v20, %v1076_v26 }
 0x179   :  { %v1008_v23 = vadd.f32 %v1007_v58, %v1006_v19  ;;  %v1140_v25 = vrot.slane %v1139_v24, 4 }
 0x17b   :  { %v1009_v28 = vrot.slane %v1008_v23, 2  ;;  %v1141_v33 = vadd.f32 %v1140_v25, %v1139_v24 }
 0x17d   :  { %v1010_v30 = vadd.f32 %v1009_v28, %v1008_v23  ;;  %v1142_v8 = vrot.slane %v1141_v33, 2 }
 0x17f   :  { %v1011_v22 = vrot.slane %v1010_v30, 1  ;;  %v1143_v31 = vadd.f32 %v1142_v8, %v1141_v33 }
 0x181   :  { %v1012_v34 = vadd.f32 %v1011_v22, %v1010_v30  ;;  %v1144_v29 = vrot.slane %v1143_v31, 1 }
 0x183   :  { %v1145_v54 = vadd.f32 %v1144_v29, %v1143_v31  ;;  %1146 = vst [vmem:[%s2137_s3] sm:$0xff] %v1012_v34 }
 0x185   :  { %1147 = vst [vmem:[%s2138_s4] sm:$0xff] %v1145_v54 }

</bundles_post_ra>
